<compile_context>
chip_gen: v5e
topology: v5e:2x2
jax: 0.10.0
libtpu: 0.0.40
codegen_flags: <defaults>
</compile_context>

<pallas_src>
import functools

import jax
import jax.numpy as jnp
from jax.experimental import pallas as pl
from jax.experimental.pallas import tpu as pltpu


def _phase1_kernel(alpha_ref, wdw_ref, colmask_ref, wpw_ref, x_ref,
                   y_ref, s1_ref, s2_ref, *, cin, cout, kh, kw, pad, H, W):
    # alpha_ref   : (1, Cin, 1)      VMEM  PReLU slopes (broadcast over B and lanes)
    # wdw_ref     : (kh*kw, Cin, 1)  VMEM  depthwise tap weights (per tap: a (Cin,1) column)
    # colmask_ref : (kw, 1, H*W)     VMEM  0/1 column-validity mask per horizontal offset
    # wpw_ref     : (Cout, Cin)      SMEM  pointwise 1x1 weights (scalar broadcasts)
    # x_ref       : (B, Cin, H*W)    VMEM  input block (B images, flattened spatial)
    # y_ref       : (B, Cout, H*W)   VMEM  pre-BN output block (lane-dense)
    # s1_ref      : (1, 1, Cout)     VMEM  per-block partial sum of y per out-channel
    # s2_ref      : (1, 1, Cout)     VMEM  per-block partial sum of y^2 per out-channel
    HW = H * W
    S = pad * (W + 1)          # max |flattened shift| for the 'same' configuration

    x = x_ref[...].astype(jnp.float32)                        # (B, Cin, HW)
    B = x.shape[0]
    xr = jnp.where(x > 0, x, x * alpha_ref[...])              # PReLU, per-channel slope

    # Zero-extend the flattened spatial axis once; every tap window is then one static lane
    # slice (XLU shift), with no per-channel masked stores/loads through a padded scratch.
    # Rows shifted past the top/bottom edge land in the zero extension, so only the
    # column (left/right edge) mask is needed.
    if S > 0:
        z = jnp.zeros((B, cin, S), jnp.float32)
        xe = jnp.concatenate([z, xr, z], axis=-1)             # (B, Cin, HW + 2S)
    else:
        xe = xr

    # Depthwise conv: kh*kw shifted windows, all channels and all images of the block in a
    # single full-width VPU op per tap.
    dw = None
    for i in range(kh):
        di = i - pad
        for j in range(kw):
            dj = j - pad
            d = di * W + dj
            win = xr if d == 0 else xe[:, :, S + d:S + d + HW]
            if dj != 0:
                win = win * colmask_ref[j]                    # (1, HW) broadcast
            term = win * wdw_ref[i * kw + j]                  # (Cin, 1) broadcast
            dw = term if dw is None else dw + term

    # Pointwise 1x1 conv folded on the VPU; BN partial statistics come straight from the
    # in-register accumulators (no readback of y from VMEM).
    dw_c = [dw[:, c, :] for c in range(cin)]                  # hoisted (B, HW) channel slabs
    t1_cols, t2_cols = [], []
    for o in range(cout):
        acc = dw_c[0] * wpw_ref[o, 0]
        for c in range(1, cin):
            acc = acc + dw_c[c] * wpw_ref[o, c]
        y_ref[:, o, :] = acc                                  # full-width lane-dense store
        t1_cols.append(jnp.sum(acc, axis=-1, keepdims=True))          # (B, 1)
        t2_cols.append(jnp.sum(acc * acc, axis=-1, keepdims=True))    # (B, 1)
    t1 = jnp.concatenate(t1_cols, axis=-1)                    # (B, Cout)
    t2 = jnp.concatenate(t2_cols, axis=-1)
    s1_ref[0] = jnp.sum(t1, axis=0, keepdims=True)            # (1, Cout)
    s2_ref[0] = jnp.sum(t2, axis=0, keepdims=True)


def _bn_apply_kernel(scale_ref, shift_ref, y_ref, o_ref):
    # Folded BN affine as one broadcast FMA over the whole (B, Cout, Ho*Wo) block.
    o_ref[...] = (y_ref[...] * scale_ref[...] + shift_ref[...]).astype(o_ref.dtype)


def dwconv_reference(x, alpha, w_dw, w_pw, gamma, beta, *, stride, padding, eps=1e-5):
    """Pure-JAX reference (NCHW); also the fallback for non-'same'/strided configs."""
    C_in = x.shape[1]
    xr = jnp.where(x > 0, x, x * alpha[None, :, None, None])
    dw = jax.lax.conv_general_dilated(
        xr, w_dw, (stride, stride), [(padding, padding), (padding, padding)],
        dimension_numbers=('NCHW', 'OIHW', 'NCHW'),
        feature_group_count=C_in, precision=jax.lax.Precision.HIGHEST)
    pw = jax.lax.conv_general_dilated(
        dw, w_pw, (1, 1), [(0, 0), (0, 0)],
        dimension_numbers=('NCHW', 'OIHW', 'NCHW'),
        precision=jax.lax.Precision.HIGHEST)
    mean = pw.mean(axis=(0, 2, 3), keepdims=True)
    var = ((pw - mean) ** 2).mean(axis=(0, 2, 3), keepdims=True)
    yhat = (pw - mean) * jax.lax.rsqrt(var + eps)
    return yhat * gamma[None, :, None, None] + beta[None, :, None, None]


def dwconv_forward(x, alpha, w_dw, w_pw, gamma, beta,
                   *, kernel_size, stride, padding, eps=1e-5):
    """PyTorch-compatible DWConv forward. x is NCHW; weights in PyTorch layouts."""
    N, C_in, H, W = x.shape
    C_out = w_pw.shape[0]
    kh = kw = kernel_size

    if stride != 1 or 2 * padding != kernel_size - 1:
        # TODO(synk): strided / non-'same'-padding configs use the XLA conv fallback above
        # (exact forward semantics, just not a Pallas kernel).
        return dwconv_reference(x, alpha, w_dw, w_pw, gamma, beta,
                                stride=stride, padding=padding, eps=eps)

    Ho, Wo = H, W
    HW = H * W

    # --- block sizing: batch B images per grid step --------------------------------------
    bytes_in = C_in * HW * 4
    bytes_y = C_out * HW * 4
    B = max(1, min((1 << 20) // max(bytes_in, 1),              # ~>=1 MiB of input per step
                   (4 << 20) // max(bytes_in + bytes_y, 1)))   # 2x(in+y) blocks + temporaries
                                                               # stay well inside 32 MiB VMEM
    if N >= 2:
        B = min(B, (N + 1) // 2)      # keep the grid >= 2 steps (v7x megacore split)
    B = max(1, min(B, N))
    G = (N + B - 1) // B
    N_pad = G * B

    # Free metadata reshape (collapse of contiguous trailing dims).  If the batch is padded,
    # the zero images produce y == 0 and contribute nothing to the BN sums.
    x_flat = x.reshape(N, C_in, HW)
    if N_pad != N:
        x_flat = jnp.concatenate(
            [x_flat, jnp.zeros((N_pad - N, C_in, HW), x.dtype)], axis=0)

    # Parameter tables (tiny).
    alpha_v = alpha.reshape(1, C_in, 1).astype(jnp.float32)
    wdw_v = (w_dw.reshape(C_in, kh * kw).T).reshape(kh * kw, C_in, 1).astype(jnp.float32)
    wpw_s = w_pw.reshape(C_out, C_in).astype(jnp.float32)
    colp = jnp.arange(HW, dtype=jnp.int32) % W
    colmask = jnp.stack(
        [jnp.logical_and(colp + (j - padding) >= 0, colp + (j - padding) < W)
         .astype(jnp.float32).reshape(1, HW) for j in range(kw)], axis=0)   # (kw, 1, HW)

    smem = pl.BlockSpec(memory_space=pltpu.MemorySpace.SMEM)
    cparams = pltpu.CompilerParams(
        dimension_semantics=("parallel",),      # batch blocks shard across v7x's 2 TCs
        vmem_limit_bytes=32 * 1024 * 1024,      # safe for v5e/v6e/v7x scoped VMEM
    )

    phase1 = functools.partial(_phase1_kernel, cin=C_in, cout=C_out,
                               kh=kh, kw=kw, pad=padding, H=H, W=W)
    y, s1, s2 = pl.pallas_call(
        phase1,
        grid=(G,),
        in_specs=[pl.BlockSpec((1, C_in, 1), lambda n: (0, 0, 0)),
                  pl.BlockSpec((kh * kw, C_in, 1), lambda n: (0, 0, 0)),
                  pl.BlockSpec((kw, 1, HW), lambda n: (0, 0, 0)),
                  smem,
                  pl.BlockSpec((B, C_in, HW), lambda n: (n, 0, 0))],
        out_specs=(pl.BlockSpec((B, C_out, HW), lambda n: (n, 0, 0)),
                   pl.BlockSpec((1, 1, C_out), lambda n: (n, 0, 0)),
                   pl.BlockSpec((1, 1, C_out), lambda n: (n, 0, 0))),
        out_shape=(jax.ShapeDtypeStruct((N_pad, C_out, HW), jnp.float32),
                   jax.ShapeDtypeStruct((G, 1, C_out), jnp.float32),
                   jax.ShapeDtypeStruct((G, 1, C_out), jnp.float32)),
        compiler_params=cparams,
    )(alpha_v, wdw_v, colmask, wpw_s, x_flat)

    # Global BatchNorm statistics (training mode, biased variance) from per-block partial
    # sums; fold gamma/beta/mean/var into one per-channel scale & shift.
    # NOTE: one-pass E[y^2]-E[y]^2 in f32 is fine at these sizes; prefer centered/two-pass
    # sums for very large N*Ho*Wo.
    cnt = jnp.float32(N * Ho * Wo)
    sum_y = jnp.sum(s1[:, 0, :], axis=0)
    sum_yy = jnp.sum(s2[:, 0, :], axis=0)
    mean = sum_y / cnt
    var = jnp.maximum(sum_yy / cnt - mean * mean, 0.0)
    inv = jax.lax.rsqrt(var + eps)
    scale = (gamma.astype(jnp.float32) * inv).reshape(1, C_out, 1)
    shift = (beta.astype(jnp.float32) - mean * gamma.astype(jnp.float32) * inv
             ).reshape(1, C_out, 1)

    # Phase 2: one broadcast FMA per (B, Cout, Ho*Wo) block; alias y's HBM buffer to the
    # output when dtypes match (no extra activation-sized allocation).
    out_dtype = x.dtype
    alias = {2: 0} if out_dtype == jnp.float32 else {}
    out_flat = pl.pallas_call(
        _bn_apply_kernel,
        grid=(G,),
        in_specs=[pl.BlockSpec((1, C_out, 1), lambda n: (0, 0, 0)),
                  pl.BlockSpec((1, C_out, 1), lambda n: (0, 0, 0)),
                  pl.BlockSpec((B, C_out, HW), lambda n: (n, 0, 0))],
        out_specs=pl.BlockSpec((B, C_out, HW), lambda n: (n, 0, 0)),
        out_shape=jax.ShapeDtypeStruct((N_pad, C_out, HW), out_dtype),
        input_output_aliases=alias,
        compiler_params=cparams,
    )(scale, shift, y)

    if N_pad != N:
        out_flat = out_flat[:N]
    return out_flat.reshape(N, C_out, Ho, Wo)                  # free reshape back to NCHW


if __name__ == "__main__":
    N, C_in, C_out, H, W = 2, 4, 8, 16, 16
    kernel_size, stride, padding = 3, 1, 1

    key = jax.random.PRNGKey(0)
    k1, k2, k3, k4, k5 = jax.random.split(key, 5)

    x = jax.random.normal(k1, (N, C_in, H, W), jnp.float32)
    alpha = jnp.full((C_in,), 0.25, jnp.float32)                      # PReLU default init
    w_dw = 0.2 * jax.random.normal(k2, (C_in, 1, kernel_size, kernel_size), jnp.float32)
    w_pw = 0.2 * jax.random.normal(k3, (C_out, C_in, 1, 1), jnp.float32)
    gamma = 1.0 + 0.1 * jax.random.normal(k4, (C_out,), jnp.float32)  # BN affine weight
    beta = 0.1 * jax.random.normal(k5, (C_out,), jnp.float32)         # BN affine bias

    fwd = jax.jit(functools.partial(dwconv_forward, kernel_size=kernel_size,
                                    stride=stride, padding=padding))
    out = jax.block_until_ready(fwd(x, alpha, w_dw, w_pw, gamma, beta))

    ref = dwconv_reference(x, alpha, w_dw, w_pw, gamma, beta,
                           stride=stride, padding=padding)
    assert out.shape == (N, C_out, H, W)
    err = jnp.max(jnp.abs(out - ref))
    assert jnp.allclose(out, ref, rtol=1e-3, atol=1e-3), f"max abs err = {err}"

    print("KERNEL_OK")
</pallas_src>

<mosaic_0001>
module attributes {stable_mosaic.version = 11 : i64} {
  func.func @_bn_apply_kernel(%arg0: i32, %arg1: memref<1x8x1xf32, #tpu.memory_space<vmem>>, %arg2: memref<1x8x1xf32, #tpu.memory_space<vmem>>, %arg3: memref<1x8x256xf32, #tpu.memory_space<vmem>>, %arg4: memref<1x8x256xf32, #tpu.memory_space<vmem>>) attributes {dimension_semantics = [#tpu.dimension_semantics<parallel>], iteration_bounds = array<i64: 2>, scalar_prefetch = 0 : i64, scratch_operands = 0 : i64, tpu.core_type = #tpu.core_type<tc>, window_params = [{pipeline_mode = #tpu.pipeline_mode<synchronous>, transform_indices = @transform_0, window_bounds = array<i64: 1, 8, 1>}, {pipeline_mode = #tpu.pipeline_mode<synchronous>, transform_indices = @transform_1, window_bounds = array<i64: 1, 8, 1>}, {transform_indices = @transform_2, window_bounds = array<i64: 1, 8, 256>}, {transform_indices = @transform_3, window_bounds = array<i64: 1, 8, 256>}]} {
    %c0 = arith.constant 0 : index
    %c0_0 = arith.constant 0 : index
    %c0_1 = arith.constant 0 : index
    %0 = vector.load %arg3[%c0, %c0_0, %c0_1] : memref<1x8x256xf32, #tpu.memory_space<vmem>>, vector<1x8x256xf32>
    %c0_2 = arith.constant 0 : index
    %c0_3 = arith.constant 0 : index
    %c0_4 = arith.constant 0 : index
    %1 = vector.load %arg1[%c0_2, %c0_3, %c0_4] : memref<1x8x1xf32, #tpu.memory_space<vmem>>, vector<1x8x1xf32>
    %2 = vector.broadcast %1 : vector<1x8x1xf32> to vector<1x8x256xf32>
    %3 = arith.mulf %0, %2 : vector<1x8x256xf32>
    %c0_5 = arith.constant 0 : index
    %c0_6 = arith.constant 0 : index
    %c0_7 = arith.constant 0 : index
    %4 = vector.load %arg2[%c0_5, %c0_6, %c0_7] : memref<1x8x1xf32, #tpu.memory_space<vmem>>, vector<1x8x1xf32>
    %5 = vector.broadcast %4 : vector<1x8x1xf32> to vector<1x8x256xf32>
    %6 = arith.addf %3, %5 : vector<1x8x256xf32>
    %c0_8 = arith.constant 0 : index
    %c0_9 = arith.constant 0 : index
    %c0_10 = arith.constant 0 : index
    %7 = vector.load %arg4[%c0_8, %c0_9, %c0_10] : memref<1x8x256xf32, #tpu.memory_space<vmem>>, vector<1x8x256xf32>
    tpu.vector_store %arg4[%c0_8, %c0_9, %c0_10], %6 {strides = array<i32>} : memref<1x8x256xf32, #tpu.memory_space<vmem>>, vector<1x8x256xf32>,
    return
  }
  func.func @transform_0(%arg0: i32) -> (i32, i32, i32) {
    %c0_i32 = arith.constant 0 : i32
    %c0_i32_0 = arith.constant 0 : i32
    %c0_i32_1 = arith.constant 0 : i32
    %c0_i32_2 = arith.constant 0 : i32
    return %c0_i32, %c0_i32_0, %c0_i32_1 : i32, i32, i32
  }
  func.func @transform_1(%arg0: i32) -> (i32, i32, i32) {
    %c0_i32 = arith.constant 0 : i32
    %c0_i32_0 = arith.constant 0 : i32
    %c0_i32_1 = arith.constant 0 : i32
    %c0_i32_2 = arith.constant 0 : i32
    return %c0_i32, %c0_i32_0, %c0_i32_1 : i32, i32, i32
  }
  func.func @transform_2(%arg0: i32) -> (i32, i32, i32) {
    %c0_i32 = arith.constant 0 : i32
    %c0_i32_0 = arith.constant 0 : i32
    %c0_i32_1 = arith.constant 0 : i32
    return %arg0, %c0_i32, %c0_i32_0 : i32, i32, i32
  }
  func.func @transform_3(%arg0: i32) -> (i32, i32, i32) {
    %c0_i32 = arith.constant 0 : i32
    %c0_i32_0 = arith.constant 0 : i32
    %c0_i32_1 = arith.constant 0 : i32
    return %arg0, %c0_i32, %c0_i32_0 : i32, i32, i32
  }
}

module attributes {stable_mosaic.version = 11 : i64} {
  func.func @_phase1_kernel(%arg0: i32, %arg1: memref<1x4x1xf32, #tpu.memory_space<vmem>>, %arg2: memref<9x4x1xf32, #tpu.memory_space<vmem>>, %arg3: memref<3x1x256xf32, #tpu.memory_space<vmem>>, %arg4: memref<8x4xf32, #tpu.memory_space<smem>>, %arg5: memref<1x4x256xf32, #tpu.memory_space<vmem>>, %arg6: memref<1x8x256xf32, #tpu.memory_space<vmem>>, %arg7: memref<1x1x8xf32, #tpu.memory_space<vmem>>, %arg8: memref<1x1x8xf32, #tpu.memory_space<vmem>>) attributes {dimension_semantics = [#tpu.dimension_semantics<parallel>], iteration_bounds = array<i64: 2>, scalar_prefetch = 0 : i64, scratch_operands = 0 : i64, tpu.core_type = #tpu.core_type<tc>, window_params = [{pipeline_mode = #tpu.pipeline_mode<synchronous>, transform_indices = @transform_0, window_bounds = array<i64: 1, 4, 1>}, {pipeline_mode = #tpu.pipeline_mode<synchronous>, transform_indices = @transform_1, window_bounds = array<i64: 9, 4, 1>}, {pipeline_mode = #tpu.pipeline_mode<synchronous>, transform_indices = @transform_2, window_bounds = array<i64: 3, 1, 256>}, {transform_indices = @transform_3, window_bounds = array<i64: 8, 4>}, {transform_indices = @transform_4, window_bounds = array<i64: 1, 4, 256>}, {transform_indices = @transform_5, window_bounds = array<i64: 1, 8, 256>}, {transform_indices = @transform_6, window_bounds = array<i64: 1, 1, 8>}, {transform_indices = @transform_7, window_bounds = array<i64: 1, 1, 8>}]} {
    %c0 = arith.constant 0 : index
    %c0_0 = arith.constant 0 : index
    %c0_1 = arith.constant 0 : index
    %0 = vector.load %arg5[%c0, %c0_0, %c0_1] : memref<1x4x256xf32, #tpu.memory_space<vmem>>, vector<1x4x256xf32>
    %cst = arith.constant 0.000000e+00 : f32
    %1 = vector.broadcast %cst : f32 to vector<1x4x256xf32>
    %2 = arith.cmpf ogt, %0, %1 : vector<1x4x256xf32>
    %c0_2 = arith.constant 0 : index
    %c0_3 = arith.constant 0 : index
    %c0_4 = arith.constant 0 : index
    %3 = vector.load %arg1[%c0_2, %c0_3, %c0_4] : memref<1x4x1xf32, #tpu.memory_space<vmem>>, vector<1x4x1xf32>
    %4 = vector.broadcast %3 : vector<1x4x1xf32> to vector<1x4x256xf32>
    %5 = arith.mulf %0, %4 : vector<1x4x256xf32>
    %6 = arith.select %2, %0, %5 : vector<1x4x256xi1>, vector<1x4x256xf32>
    %cst_5 = arith.constant 0.000000e+00 : f32
    %7 = vector.broadcast %cst_5 : f32 to vector<1x4x17xf32>
    %8 = tpu.concatenate %7, %6, %7 in 2 : vector<1x4x17xf32>, vector<1x4x256xf32>, vector<1x4x17xf32> -> vector<1x4x290xf32>
    %9 = vector.extract_strided_slice %8 {offsets = [0, 0, 0], sizes = [1, 4, 256], strides = [1, 1, 1]} : vector<1x4x290xf32> to vector<1x4x256xf32>
    %c0_6 = arith.constant 0 : index
    %c0_7 = arith.constant 0 : index
    %c0_8 = arith.constant 0 : index
    %10 = vector.load %arg3[%c0_6, %c0_7, %c0_8] : memref<3x1x256xf32, #tpu.memory_space<vmem>>, vector<1x1x256xf32>
    %11 = vector.shape_cast %10 : vector<1x1x256xf32> to vector<1x256xf32>
    %12 = vector.shape_cast %11 : vector<1x256xf32> to vector<1x1x256xf32>
    %13 = vector.broadcast %12 : vector<1x1x256xf32> to vector<1x4x256xf32>
    %14 = arith.mulf %9, %13 : vector<1x4x256xf32>
    %c0_9 = arith.constant 0 : index
    %c0_10 = arith.constant 0 : index
    %c0_11 = arith.constant 0 : index
    %15 = vector.load %arg2[%c0_9, %c0_10, %c0_11] : memref<9x4x1xf32, #tpu.memory_space<vmem>>, vector<1x4x1xf32>
    %16 = vector.shape_cast %15 : vector<1x4x1xf32> to vector<4x1xf32>
    %17 = vector.shape_cast %16 : vector<4x1xf32> to vector<1x4x1xf32>
    %18 = vector.broadcast %17 : vector<1x4x1xf32> to vector<1x4x256xf32>
    %19 = arith.mulf %14, %18 : vector<1x4x256xf32>
    %20 = vector.extract_strided_slice %8 {offsets = [0, 0, 1], sizes = [1, 4, 256], strides = [1, 1, 1]} : vector<1x4x290xf32> to vector<1x4x256xf32>
    %c1 = arith.constant 1 : index
    %c0_12 = arith.constant 0 : index
    %c0_13 = arith.constant 0 : index
    %21 = vector.load %arg2[%c1, %c0_12, %c0_13] : memref<9x4x1xf32, #tpu.memory_space<vmem>>, vector<1x4x1xf32>
    %22 = vector.shape_cast %21 : vector<1x4x1xf32> to vector<4x1xf32>
    %23 = vector.shape_cast %22 : vector<4x1xf32> to vector<1x4x1xf32>
    %24 = vector.broadcast %23 : vector<1x4x1xf32> to vector<1x4x256xf32>
    %25 = arith.mulf %20, %24 : vector<1x4x256xf32>
    %26 = arith.addf %19, %25 : vector<1x4x256xf32>
    %27 = vector.extract_strided_slice %8 {offsets = [0, 0, 2], sizes = [1, 4, 256], strides = [1, 1, 1]} : vector<1x4x290xf32> to vector<1x4x256xf32>
    %c2 = arith.constant 2 : index
    %c0_14 = arith.constant 0 : index
    %c0_15 = arith.constant 0 : index
    %28 = vector.load %arg3[%c2, %c0_14, %c0_15] : memref<3x1x256xf32, #tpu.memory_space<vmem>>, vector<1x1x256xf32>
    %29 = vector.shape_cast %28 : vector<1x1x256xf32> to vector<1x256xf32>
    %30 = vector.shape_cast %29 : vector<1x256xf32> to vector<1x1x256xf32>
    %31 = vector.broadcast %30 : vector<1x1x256xf32> to vector<1x4x256xf32>
    %32 = arith.mulf %27, %31 : vector<1x4x256xf32>
    %c2_16 = arith.constant 2 : index
    %c0_17 = arith.constant 0 : index
    %c0_18 = arith.constant 0 : index
    %33 = vector.load %arg2[%c2_16, %c0_17, %c0_18] : memref<9x4x1xf32, #tpu.memory_space<vmem>>, vector<1x4x1xf32>
    %34 = vector.shape_cast %33 : vector<1x4x1xf32> to vector<4x1xf32>
    %35 = vector.shape_cast %34 : vector<4x1xf32> to vector<1x4x1xf32>
    %36 = vector.broadcast %35 : vector<1x4x1xf32> to vector<1x4x256xf32>
    %37 = arith.mulf %32, %36 : vector<1x4x256xf32>
    %38 = arith.addf %26, %37 : vector<1x4x256xf32>
    %39 = vector.extract_strided_slice %8 {offsets = [0, 0, 16], sizes = [1, 4, 256], strides = [1, 1, 1]} : vector<1x4x290xf32> to vector<1x4x256xf32>
    %c0_19 = arith.constant 0 : index
    %c0_20 = arith.constant 0 : index
    %c0_21 = arith.constant 0 : index
    %40 = vector.load %arg3[%c0_19, %c0_20, %c0_21] : memref<3x1x256xf32, #tpu.memory_space<vmem>>, vector<1x1x256xf32>
    %41 = vector.shape_cast %40 : vector<1x1x256xf32> to vector<1x256xf32>
    %42 = vector.shape_cast %41 : vector<1x256xf32> to vector<1x1x256xf32>
    %43 = vector.broadcast %42 : vector<1x1x256xf32> to vector<1x4x256xf32>
    %44 = arith.mulf %39, %43 : vector<1x4x256xf32>
    %c3 = arith.constant 3 : index
    %c0_22 = arith.constant 0 : index
    %c0_23 = arith.constant 0 : index
    %45 = vector.load %arg2[%c3, %c0_22, %c0_23] : memref<9x4x1xf32, #tpu.memory_space<vmem>>, vector<1x4x1xf32>
    %46 = vector.shape_cast %45 : vector<1x4x1xf32> to vector<4x1xf32>
    %47 = vector.shape_cast %46 : vector<4x1xf32> to vector<1x4x1xf32>
    %48 = vector.broadcast %47 : vector<1x4x1xf32> to vector<1x4x256xf32>
    %49 = arith.mulf %44, %48 : vector<1x4x256xf32>
    %50 = arith.addf %38, %49 : vector<1x4x256xf32>
    %c4 = arith.constant 4 : index
    %c0_24 = arith.constant 0 : index
    %c0_25 = arith.constant 0 : index
    %51 = vector.load %arg2[%c4, %c0_24, %c0_25] : memref<9x4x1xf32, #tpu.memory_space<vmem>>, vector<1x4x1xf32>
    %52 = vector.shape_cast %51 : vector<1x4x1xf32> to vector<4x1xf32>
    %53 = vector.shape_cast %52 : vector<4x1xf32> to vector<1x4x1xf32>
    %54 = vector.broadcast %53 : vector<1x4x1xf32> to vector<1x4x256xf32>
    %55 = arith.mulf %6, %54 : vector<1x4x256xf32>
    %56 = arith.addf %50, %55 : vector<1x4x256xf32>
    %57 = vector.extract_strided_slice %8 {offsets = [0, 0, 18], sizes = [1, 4, 256], strides = [1, 1, 1]} : vector<1x4x290xf32> to vector<1x4x256xf32>
    %c2_26 = arith.constant 2 : index
    %c0_27 = arith.constant 0 : index
    %c0_28 = arith.constant 0 : index
    %58 = vector.load %arg3[%c2_26, %c0_27, %c0_28] : memref<3x1x256xf32, #tpu.memory_space<vmem>>, vector<1x1x256xf32>
    %59 = vector.shape_cast %58 : vector<1x1x256xf32> to vector<1x256xf32>
    %60 = vector.shape_cast %59 : vector<1x256xf32> to vector<1x1x256xf32>
    %61 = vector.broadcast %60 : vector<1x1x256xf32> to vector<1x4x256xf32>
    %62 = arith.mulf %57, %61 : vector<1x4x256xf32>
    %c5 = arith.constant 5 : index
    %c0_29 = arith.constant 0 : index
    %c0_30 = arith.constant 0 : index
    %63 = vector.load %arg2[%c5, %c0_29, %c0_30] : memref<9x4x1xf32, #tpu.memory_space<vmem>>, vector<1x4x1xf32>
    %64 = vector.shape_cast %63 : vector<1x4x1xf32> to vector<4x1xf32>
    %65 = vector.shape_cast %64 : vector<4x1xf32> to vector<1x4x1xf32>
    %66 = vector.broadcast %65 : vector<1x4x1xf32> to vector<1x4x256xf32>
    %67 = arith.mulf %62, %66 : vector<1x4x256xf32>
    %68 = arith.addf %56, %67 : vector<1x4x256xf32>
    %69 = vector.extract_strided_slice %8 {offsets = [0, 0, 32], sizes = [1, 4, 256], strides = [1, 1, 1]} : vector<1x4x290xf32> to vector<1x4x256xf32>
    %c0_31 = arith.constant 0 : index
    %c0_32 = arith.constant 0 : index
    %c0_33 = arith.constant 0 : index
    %70 = vector.load %arg3[%c0_31, %c0_32, %c0_33] : memref<3x1x256xf32, #tpu.memory_space<vmem>>, vector<1x1x256xf32>
    %71 = vector.shape_cast %70 : vector<1x1x256xf32> to vector<1x256xf32>
    %72 = vector.shape_cast %71 : vector<1x256xf32> to vector<1x1x256xf32>
    %73 = vector.broadcast %72 : vector<1x1x256xf32> to vector<1x4x256xf32>
    %74 = arith.mulf %69, %73 : vector<1x4x256xf32>
    %c6 = arith.constant 6 : index
    %c0_34 = arith.constant 0 : index
    %c0_35 = arith.constant 0 : index
    %75 = vector.load %arg2[%c6, %c0_34, %c0_35] : memref<9x4x1xf32, #tpu.memory_space<vmem>>, vector<1x4x1xf32>
    %76 = vector.shape_cast %75 : vector<1x4x1xf32> to vector<4x1xf32>
    %77 = vector.shape_cast %76 : vector<4x1xf32> to vector<1x4x1xf32>
    %78 = vector.broadcast %77 : vector<1x4x1xf32> to vector<1x4x256xf32>
    %79 = arith.mulf %74, %78 : vector<1x4x256xf32>
    %80 = arith.addf %68, %79 : vector<1x4x256xf32>
    %81 = vector.extract_strided_slice %8 {offsets = [0, 0, 33], sizes = [1, 4, 256], strides = [1, 1, 1]} : vector<1x4x290xf32> to vector<1x4x256xf32>
    %c7 = arith.constant 7 : index
    %c0_36 = arith.constant 0 : index
    %c0_37 = arith.constant 0 : index
    %82 = vector.load %arg2[%c7, %c0_36, %c0_37] : memref<9x4x1xf32, #tpu.memory_space<vmem>>, vector<1x4x1xf32>
    %83 = vector.shape_cast %82 : vector<1x4x1xf32> to vector<4x1xf32>
    %84 = vector.shape_cast %83 : vector<4x1xf32> to vector<1x4x1xf32>
    %85 = vector.broadcast %84 : vector<1x4x1xf32> to vector<1x4x256xf32>
    %86 = arith.mulf %81, %85 : vector<1x4x256xf32>
    %87 = arith.addf %80, %86 : vector<1x4x256xf32>
    %88 = vector.extract_strided_slice %8 {offsets = [0, 0, 34], sizes = [1, 4, 256], strides = [1, 1, 1]} : vector<1x4x290xf32> to vector<1x4x256xf32>
    %c2_38 = arith.constant 2 : index
    %c0_39 = arith.constant 0 : index
    %c0_40 = arith.constant 0 : index
    %89 = vector.load %arg3[%c2_38, %c0_39, %c0_40] : memref<3x1x256xf32, #tpu.memory_space<vmem>>, vector<1x1x256xf32>
    %90 = vector.shape_cast %89 : vector<1x1x256xf32> to vector<1x256xf32>
    %91 = vector.shape_cast %90 : vector<1x256xf32> to vector<1x1x256xf32>
    %92 = vector.broadcast %91 : vector<1x1x256xf32> to vector<1x4x256xf32>
    %93 = arith.mulf %88, %92 : vector<1x4x256xf32>
    %c8 = arith.constant 8 : index
    %c0_41 = arith.constant 0 : index
    %c0_42 = arith.constant 0 : index
    %94 = vector.load %arg2[%c8, %c0_41, %c0_42] : memref<9x4x1xf32, #tpu.memory_space<vmem>>, vector<1x4x1xf32>
    %95 = vector.shape_cast %94 : vector<1x4x1xf32> to vector<4x1xf32>
    %96 = vector.shape_cast %95 : vector<4x1xf32> to vector<1x4x1xf32>
    %97 = vector.broadcast %96 : vector<1x4x1xf32> to vector<1x4x256xf32>
    %98 = arith.mulf %93, %97 : vector<1x4x256xf32>
    %99 = arith.addf %87, %98 : vector<1x4x256xf32>
    %100 = vector.extract_strided_slice %99 {offsets = [0, 0, 0], sizes = [1, 1, 256], strides = [1, 1, 1]} : vector<1x4x256xf32> to vector<1x1x256xf32>
    %101 = vector.shape_cast %100 : vector<1x1x256xf32> to vector<1x256xf32>
    %102 = vector.extract_strided_slice %99 {offsets = [0, 1, 0], sizes = [1, 1, 256], strides = [1, 1, 1]} : vector<1x4x256xf32> to vector<1x1x256xf32>
    %103 = vector.shape_cast %102 : vector<1x1x256xf32> to vector<1x256xf32>
    %104 = vector.extract_strided_slice %99 {offsets = [0, 2, 0], sizes = [1, 1, 256], strides = [1, 1, 1]} : vector<1x4x256xf32> to vector<1x1x256xf32>
    %105 = vector.shape_cast %104 : vector<1x1x256xf32> to vector<1x256xf32>
    %106 = vector.extract_strided_slice %99 {offsets = [0, 3, 0], sizes = [1, 1, 256], strides = [1, 1, 1]} : vector<1x4x256xf32> to vector<1x1x256xf32>
    %107 = vector.shape_cast %106 : vector<1x1x256xf32> to vector<1x256xf32>
    %c0_43 = arith.constant 0 : index
    %c0_44 = arith.constant 0 : index
    %108 = memref.load %arg4[%c0_43, %c0_44] : memref<8x4xf32, #tpu.memory_space<smem>>
    %109 = vector.broadcast %108 : f32 to vector<1x256xf32>
    %110 = arith.mulf %101, %109 : vector<1x256xf32>
    %c0_45 = arith.constant 0 : index
    %c1_46 = arith.constant 1 : index
    %111 = memref.load %arg4[%c0_45, %c1_46] : memref<8x4xf32, #tpu.memory_space<smem>>
    %112 = vector.broadcast %111 : f32 to vector<1x256xf32>
    %113 = arith.mulf %103, %112 : vector<1x256xf32>
    %114 = arith.addf %110, %113 : vector<1x256xf32>
    %c0_47 = arith.constant 0 : index
    %c2_48 = arith.constant 2 : index
    %115 = memref.load %arg4[%c0_47, %c2_48] : memref<8x4xf32, #tpu.memory_space<smem>>
    %116 = vector.broadcast %115 : f32 to vector<1x256xf32>
    %117 = arith.mulf %105, %116 : vector<1x256xf32>
    %118 = arith.addf %114, %117 : vector<1x256xf32>
    %c0_49 = arith.constant 0 : index
    %c3_50 = arith.constant 3 : index
    %119 = memref.load %arg4[%c0_49, %c3_50] : memref<8x4xf32, #tpu.memory_space<smem>>
    %120 = vector.broadcast %119 : f32 to vector<1x256xf32>
    %121 = arith.mulf %107, %120 : vector<1x256xf32>
    %122 = arith.addf %118, %121 : vector<1x256xf32>
    %c0_51 = arith.constant 0 : index
    %c0_52 = arith.constant 0 : index
    %c0_53 = arith.constant 0 : index
    %123 = vector.load %arg6[%c0_51, %c0_52, %c0_53] : memref<1x8x256xf32, #tpu.memory_space<vmem>>, vector<1x1x256xf32>
    %124 = vector.shape_cast %123 : vector<1x1x256xf32> to vector<1x256xf32>
    %125 = vector.shape_cast %122 : vector<1x256xf32> to vector<1x1x256xf32>
    tpu.vector_store %arg6[%c0_51, %c0_52, %c0_53], %125 {strides = array<i32>} : memref<1x8x256xf32, #tpu.memory_space<vmem>>, vector<1x1x256xf32>,
    %cst_54 = arith.constant dense<0.000000e+00> : vector<1xf32>
    %126 = vector.multi_reduction <add>, %122, %cst_54 [1] : vector<1x256xf32> to vector<1xf32>
    %127 = vector.shape_cast %126 : vector<1xf32> to vector<1x1xf32>
    %128 = arith.mulf %122, %122 : vector<1x256xf32>
    %cst_55 = arith.constant dense<0.000000e+00> : vector<1xf32>
    %129 = vector.multi_reduction <add>, %128, %cst_55 [1] : vector<1x256xf32> to vector<1xf32>
    %130 = vector.shape_cast %129 : vector<1xf32> to vector<1x1xf32>
    %c1_56 = arith.constant 1 : index
    %c0_57 = arith.constant 0 : index
    %131 = memref.load %arg4[%c1_56, %c0_57] : memref<8x4xf32, #tpu.memory_space<smem>>
    %132 = vector.broadcast %131 : f32 to vector<1x256xf32>
    %133 = arith.mulf %101, %132 : vector<1x256xf32>
    %c1_58 = arith.constant 1 : index
    %c1_59 = arith.constant 1 : index
    %134 = memref.load %arg4[%c1_58, %c1_59] : memref<8x4xf32, #tpu.memory_space<smem>>
    %135 = vector.broadcast %134 : f32 to vector<1x256xf32>
    %136 = arith.mulf %103, %135 : vector<1x256xf32>
    %137 = arith.addf %133, %136 : vector<1x256xf32>
    %c1_60 = arith.constant 1 : index
    %c2_61 = arith.constant 2 : index
    %138 = memref.load %arg4[%c1_60, %c2_61] : memref<8x4xf32, #tpu.memory_space<smem>>
    %139 = vector.broadcast %138 : f32 to vector<1x256xf32>
    %140 = arith.mulf %105, %139 : vector<1x256xf32>
    %141 = arith.addf %137, %140 : vector<1x256xf32>
    %c1_62 = arith.constant 1 : index
    %c3_63 = arith.constant 3 : index
    %142 = memref.load %arg4[%c1_62, %c3_63] : memref<8x4xf32, #tpu.memory_space<smem>>
    %143 = vector.broadcast %142 : f32 to vector<1x256xf32>
    %144 = arith.mulf %107, %143 : vector<1x256xf32>
    %145 = arith.addf %141, %144 : vector<1x256xf32>
    %c0_64 = arith.constant 0 : index
    %c1_65 = arith.constant 1 : index
    %c0_66 = arith.constant 0 : index
    %146 = vector.load %arg6[%c0_64, %c1_65, %c0_66] : memref<1x8x256xf32, #tpu.memory_space<vmem>>, vector<1x1x256xf32>
    %147 = vector.shape_cast %146 : vector<1x1x256xf32> to vector<1x256xf32>
    %148 = vector.shape_cast %145 : vector<1x256xf32> to vector<1x1x256xf32>
    tpu.vector_store %arg6[%c0_64, %c1_65, %c0_66], %148 {strides = array<i32>} : memref<1x8x256xf32, #tpu.memory_space<vmem>>, vector<1x1x256xf32>,
    %cst_67 = arith.constant dense<0.000000e+00> : vector<1xf32>
    %149 = vector.multi_reduction <add>, %145, %cst_67 [1] : vector<1x256xf32> to vector<1xf32>
    %150 = vector.shape_cast %149 : vector<1xf32> to vector<1x1xf32>
    %151 = arith.mulf %145, %145 : vector<1x256xf32>
    %cst_68 = arith.constant dense<0.000000e+00> : vector<1xf32>
    %152 = vector.multi_reduction <add>, %151, %cst_68 [1] : vector<1x256xf32> to vector<1xf32>
    %153 = vector.shape_cast %152 : vector<1xf32> to vector<1x1xf32>
    %c2_69 = arith.constant 2 : index
    %c0_70 = arith.constant 0 : index
    %154 = memref.load %arg4[%c2_69, %c0_70] : memref<8x4xf32, #tpu.memory_space<smem>>
    %155 = vector.broadcast %154 : f32 to vector<1x256xf32>
    %156 = arith.mulf %101, %155 : vector<1x256xf32>
    %c2_71 = arith.constant 2 : index
    %c1_72 = arith.constant 1 : index
    %157 = memref.load %arg4[%c2_71, %c1_72] : memref<8x4xf32, #tpu.memory_space<smem>>
    %158 = vector.broadcast %157 : f32 to vector<1x256xf32>
    %159 = arith.mulf %103, %158 : vector<1x256xf32>
    %160 = arith.addf %156, %159 : vector<1x256xf32>
    %c2_73 = arith.constant 2 : index
    %c2_74 = arith.constant 2 : index
    %161 = memref.load %arg4[%c2_73, %c2_74] : memref<8x4xf32, #tpu.memory_space<smem>>
    %162 = vector.broadcast %161 : f32 to vector<1x256xf32>
    %163 = arith.mulf %105, %162 : vector<1x256xf32>
    %164 = arith.addf %160, %163 : vector<1x256xf32>
    %c2_75 = arith.constant 2 : index
    %c3_76 = arith.constant 3 : index
    %165 = memref.load %arg4[%c2_75, %c3_76] : memref<8x4xf32, #tpu.memory_space<smem>>
    %166 = vector.broadcast %165 : f32 to vector<1x256xf32>
    %167 = arith.mulf %107, %166 : vector<1x256xf32>
    %168 = arith.addf %164, %167 : vector<1x256xf32>
    %c0_77 = arith.constant 0 : index
    %c2_78 = arith.constant 2 : index
    %c0_79 = arith.constant 0 : index
    %169 = vector.load %arg6[%c0_77, %c2_78, %c0_79] : memref<1x8x256xf32, #tpu.memory_space<vmem>>, vector<1x1x256xf32>
    %170 = vector.shape_cast %169 : vector<1x1x256xf32> to vector<1x256xf32>
    %171 = vector.shape_cast %168 : vector<1x256xf32> to vector<1x1x256xf32>
    tpu.vector_store %arg6[%c0_77, %c2_78, %c0_79], %171 {strides = array<i32>} : memref<1x8x256xf32, #tpu.memory_space<vmem>>, vector<1x1x256xf32>,
    %cst_80 = arith.constant dense<0.000000e+00> : vector<1xf32>
    %172 = vector.multi_reduction <add>, %168, %cst_80 [1] : vector<1x256xf32> to vector<1xf32>
    %173 = vector.shape_cast %172 : vector<1xf32> to vector<1x1xf32>
    %174 = arith.mulf %168, %168 : vector<1x256xf32>
    %cst_81 = arith.constant dense<0.000000e+00> : vector<1xf32>
    %175 = vector.multi_reduction <add>, %174, %cst_81 [1] : vector<1x256xf32> to vector<1xf32>
    %176 = vector.shape_cast %175 : vector<1xf32> to vector<1x1xf32>
    %c3_82 = arith.constant 3 : index
    %c0_83 = arith.constant 0 : index
    %177 = memref.load %arg4[%c3_82, %c0_83] : memref<8x4xf32, #tpu.memory_space<smem>>
    %178 = vector.broadcast %177 : f32 to vector<1x256xf32>
    %179 = arith.mulf %101, %178 : vector<1x256xf32>
    %c3_84 = arith.constant 3 : index
    %c1_85 = arith.constant 1 : index
    %180 = memref.load %arg4[%c3_84, %c1_85] : memref<8x4xf32, #tpu.memory_space<smem>>
    %181 = vector.broadcast %180 : f32 to vector<1x256xf32>
    %182 = arith.mulf %103, %181 : vector<1x256xf32>
    %183 = arith.addf %179, %182 : vector<1x256xf32>
    %c3_86 = arith.constant 3 : index
    %c2_87 = arith.constant 2 : index
    %184 = memref.load %arg4[%c3_86, %c2_87] : memref<8x4xf32, #tpu.memory_space<smem>>
    %185 = vector.broadcast %184 : f32 to vector<1x256xf32>
    %186 = arith.mulf %105, %185 : vector<1x256xf32>
    %187 = arith.addf %183, %186 : vector<1x256xf32>
    %c3_88 = arith.constant 3 : index
    %c3_89 = arith.constant 3 : index
    %188 = memref.load %arg4[%c3_88, %c3_89] : memref<8x4xf32, #tpu.memory_space<smem>>
    %189 = vector.broadcast %188 : f32 to vector<1x256xf32>
    %190 = arith.mulf %107, %189 : vector<1x256xf32>
    %191 = arith.addf %187, %190 : vector<1x256xf32>
    %c0_90 = arith.constant 0 : index
    %c3_91 = arith.constant 3 : index
    %c0_92 = arith.constant 0 : index
    %192 = vector.load %arg6[%c0_90, %c3_91, %c0_92] : memref<1x8x256xf32, #tpu.memory_space<vmem>>, vector<1x1x256xf32>
    %193 = vector.shape_cast %192 : vector<1x1x256xf32> to vector<1x256xf32>
    %194 = vector.shape_cast %191 : vector<1x256xf32> to vector<1x1x256xf32>
    tpu.vector_store %arg6[%c0_90, %c3_91, %c0_92], %194 {strides = array<i32>} : memref<1x8x256xf32, #tpu.memory_space<vmem>>, vector<1x1x256xf32>,
    %cst_93 = arith.constant dense<0.000000e+00> : vector<1xf32>
    %195 = vector.multi_reduction <add>, %191, %cst_93 [1] : vector<1x256xf32> to vector<1xf32>
    %196 = vector.shape_cast %195 : vector<1xf32> to vector<1x1xf32>
    %197 = arith.mulf %191, %191 : vector<1x256xf32>
    %cst_94 = arith.constant dense<0.000000e+00> : vector<1xf32>
    %198 = vector.multi_reduction <add>, %197, %cst_94 [1] : vector<1x256xf32> to vector<1xf32>
    %199 = vector.shape_cast %198 : vector<1xf32> to vector<1x1xf32>
    %c4_95 = arith.constant 4 : index
    %c0_96 = arith.constant 0 : index
    %200 = memref.load %arg4[%c4_95, %c0_96] : memref<8x4xf32, #tpu.memory_space<smem>>
    %201 = vector.broadcast %200 : f32 to vector<1x256xf32>
    %202 = arith.mulf %101, %201 : vector<1x256xf32>
    %c4_97 = arith.constant 4 : index
    %c1_98 = arith.constant 1 : index
    %203 = memref.load %arg4[%c4_97, %c1_98] : memref<8x4xf32, #tpu.memory_space<smem>>
    %204 = vector.broadcast %203 : f32 to vector<1x256xf32>
    %205 = arith.mulf %103, %204 : vector<1x256xf32>
    %206 = arith.addf %202, %205 : vector<1x256xf32>
    %c4_99 = arith.constant 4 : index
    %c2_100 = arith.constant 2 : index
    %207 = memref.load %arg4[%c4_99, %c2_100] : memref<8x4xf32, #tpu.memory_space<smem>>
    %208 = vector.broadcast %207 : f32 to vector<1x256xf32>
    %209 = arith.mulf %105, %208 : vector<1x256xf32>
    %210 = arith.addf %206, %209 : vector<1x256xf32>
    %c4_101 = arith.constant 4 : index
    %c3_102 = arith.constant 3 : index
    %211 = memref.load %arg4[%c4_101, %c3_102] : memref<8x4xf32, #tpu.memory_space<smem>>
    %212 = vector.broadcast %211 : f32 to vector<1x256xf32>
    %213 = arith.mulf %107, %212 : vector<1x256xf32>
    %214 = arith.addf %210, %213 : vector<1x256xf32>
    %c0_103 = arith.constant 0 : index
    %c4_104 = arith.constant 4 : index
    %c0_105 = arith.constant 0 : index
    %215 = vector.load %arg6[%c0_103, %c4_104, %c0_105] : memref<1x8x256xf32, #tpu.memory_space<vmem>>, vector<1x1x256xf32>
    %216 = vector.shape_cast %215 : vector<1x1x256xf32> to vector<1x256xf32>
    %217 = vector.shape_cast %214 : vector<1x256xf32> to vector<1x1x256xf32>
    tpu.vector_store %arg6[%c0_103, %c4_104, %c0_105], %217 {strides = array<i32>} : memref<1x8x256xf32, #tpu.memory_space<vmem>>, vector<1x1x256xf32>,
    %cst_106 = arith.constant dense<0.000000e+00> : vector<1xf32>
    %218 = vector.multi_reduction <add>, %214, %cst_106 [1] : vector<1x256xf32> to vector<1xf32>
    %219 = vector.shape_cast %218 : vector<1xf32> to vector<1x1xf32>
    %220 = arith.mulf %214, %214 : vector<1x256xf32>
    %cst_107 = arith.constant dense<0.000000e+00> : vector<1xf32>
    %221 = vector.multi_reduction <add>, %220, %cst_107 [1] : vector<1x256xf32> to vector<1xf32>
    %222 = vector.shape_cast %221 : vector<1xf32> to vector<1x1xf32>
    %c5_108 = arith.constant 5 : index
    %c0_109 = arith.constant 0 : index
    %223 = memref.load %arg4[%c5_108, %c0_109] : memref<8x4xf32, #tpu.memory_space<smem>>
    %224 = vector.broadcast %223 : f32 to vector<1x256xf32>
    %225 = arith.mulf %101, %224 : vector<1x256xf32>
    %c5_110 = arith.constant 5 : index
    %c1_111 = arith.constant 1 : index
    %226 = memref.load %arg4[%c5_110, %c1_111] : memref<8x4xf32, #tpu.memory_space<smem>>
    %227 = vector.broadcast %226 : f32 to vector<1x256xf32>
    %228 = arith.mulf %103, %227 : vector<1x256xf32>
    %229 = arith.addf %225, %228 : vector<1x256xf32>
    %c5_112 = arith.constant 5 : index
    %c2_113 = arith.constant 2 : index
    %230 = memref.load %arg4[%c5_112, %c2_113] : memref<8x4xf32, #tpu.memory_space<smem>>
    %231 = vector.broadcast %230 : f32 to vector<1x256xf32>
    %232 = arith.mulf %105, %231 : vector<1x256xf32>
    %233 = arith.addf %229, %232 : vector<1x256xf32>
    %c5_114 = arith.constant 5 : index
    %c3_115 = arith.constant 3 : index
    %234 = memref.load %arg4[%c5_114, %c3_115] : memref<8x4xf32, #tpu.memory_space<smem>>
    %235 = vector.broadcast %234 : f32 to vector<1x256xf32>
    %236 = arith.mulf %107, %235 : vector<1x256xf32>
    %237 = arith.addf %233, %236 : vector<1x256xf32>
    %c0_116 = arith.constant 0 : index
    %c5_117 = arith.constant 5 : index
    %c0_118 = arith.constant 0 : index
    %238 = vector.load %arg6[%c0_116, %c5_117, %c0_118] : memref<1x8x256xf32, #tpu.memory_space<vmem>>, vector<1x1x256xf32>
    %239 = vector.shape_cast %238 : vector<1x1x256xf32> to vector<1x256xf32>
    %240 = vector.shape_cast %237 : vector<1x256xf32> to vector<1x1x256xf32>
    tpu.vector_store %arg6[%c0_116, %c5_117, %c0_118], %240 {strides = array<i32>} : memref<1x8x256xf32, #tpu.memory_space<vmem>>, vector<1x1x256xf32>,
    %cst_119 = arith.constant dense<0.000000e+00> : vector<1xf32>
    %241 = vector.multi_reduction <add>, %237, %cst_119 [1] : vector<1x256xf32> to vector<1xf32>
    %242 = vector.shape_cast %241 : vector<1xf32> to vector<1x1xf32>
    %243 = arith.mulf %237, %237 : vector<1x256xf32>
    %cst_120 = arith.constant dense<0.000000e+00> : vector<1xf32>
    %244 = vector.multi_reduction <add>, %243, %cst_120 [1] : vector<1x256xf32> to vector<1xf32>
    %245 = vector.shape_cast %244 : vector<1xf32> to vector<1x1xf32>
    %c6_121 = arith.constant 6 : index
    %c0_122 = arith.constant 0 : index
    %246 = memref.load %arg4[%c6_121, %c0_122] : memref<8x4xf32, #tpu.memory_space<smem>>
    %247 = vector.broadcast %246 : f32 to vector<1x256xf32>
    %248 = arith.mulf %101, %247 : vector<1x256xf32>
    %c6_123 = arith.constant 6 : index
    %c1_124 = arith.constant 1 : index
    %249 = memref.load %arg4[%c6_123, %c1_124] : memref<8x4xf32, #tpu.memory_space<smem>>
    %250 = vector.broadcast %249 : f32 to vector<1x256xf32>
    %251 = arith.mulf %103, %250 : vector<1x256xf32>
    %252 = arith.addf %248, %251 : vector<1x256xf32>
    %c6_125 = arith.constant 6 : index
    %c2_126 = arith.constant 2 : index
    %253 = memref.load %arg4[%c6_125, %c2_126] : memref<8x4xf32, #tpu.memory_space<smem>>
    %254 = vector.broadcast %253 : f32 to vector<1x256xf32>
    %255 = arith.mulf %105, %254 : vector<1x256xf32>
    %256 = arith.addf %252, %255 : vector<1x256xf32>
    %c6_127 = arith.constant 6 : index
    %c3_128 = arith.constant 3 : index
    %257 = memref.load %arg4[%c6_127, %c3_128] : memref<8x4xf32, #tpu.memory_space<smem>>
    %258 = vector.broadcast %257 : f32 to vector<1x256xf32>
    %259 = arith.mulf %107, %258 : vector<1x256xf32>
    %260 = arith.addf %256, %259 : vector<1x256xf32>
    %c0_129 = arith.constant 0 : index
    %c6_130 = arith.constant 6 : index
    %c0_131 = arith.constant 0 : index
    %261 = vector.load %arg6[%c0_129, %c6_130, %c0_131] : memref<1x8x256xf32, #tpu.memory_space<vmem>>, vector<1x1x256xf32>
    %262 = vector.shape_cast %261 : vector<1x1x256xf32> to vector<1x256xf32>
    %263 = vector.shape_cast %260 : vector<1x256xf32> to vector<1x1x256xf32>
    tpu.vector_store %arg6[%c0_129, %c6_130, %c0_131], %263 {strides = array<i32>} : memref<1x8x256xf32, #tpu.memory_space<vmem>>, vector<1x1x256xf32>,
    %cst_132 = arith.constant dense<0.000000e+00> : vector<1xf32>
    %264 = vector.multi_reduction <add>, %260, %cst_132 [1] : vector<1x256xf32> to vector<1xf32>
    %265 = vector.shape_cast %264 : vector<1xf32> to vector<1x1xf32>
    %266 = arith.mulf %260, %260 : vector<1x256xf32>
    %cst_133 = arith.constant dense<0.000000e+00> : vector<1xf32>
    %267 = vector.multi_reduction <add>, %266, %cst_133 [1] : vector<1x256xf32> to vector<1xf32>
    %268 = vector.shape_cast %267 : vector<1xf32> to vector<1x1xf32>
    %c7_134 = arith.constant 7 : index
    %c0_135 = arith.constant 0 : index
    %269 = memref.load %arg4[%c7_134, %c0_135] : memref<8x4xf32, #tpu.memory_space<smem>>
    %270 = vector.broadcast %269 : f32 to vector<1x256xf32>
    %271 = arith.mulf %101, %270 : vector<1x256xf32>
    %c7_136 = arith.constant 7 : index
    %c1_137 = arith.constant 1 : index
    %272 = memref.load %arg4[%c7_136, %c1_137] : memref<8x4xf32, #tpu.memory_space<smem>>
    %273 = vector.broadcast %272 : f32 to vector<1x256xf32>
    %274 = arith.mulf %103, %273 : vector<1x256xf32>
    %275 = arith.addf %271, %274 : vector<1x256xf32>
    %c7_138 = arith.constant 7 : index
    %c2_139 = arith.constant 2 : index
    %276 = memref.load %arg4[%c7_138, %c2_139] : memref<8x4xf32, #tpu.memory_space<smem>>
    %277 = vector.broadcast %276 : f32 to vector<1x256xf32>
    %278 = arith.mulf %105, %277 : vector<1x256xf32>
    %279 = arith.addf %275, %278 : vector<1x256xf32>
    %c7_140 = arith.constant 7 : index
    %c3_141 = arith.constant 3 : index
    %280 = memref.load %arg4[%c7_140, %c3_141] : memref<8x4xf32, #tpu.memory_space<smem>>
    %281 = vector.broadcast %280 : f32 to vector<1x256xf32>
    %282 = arith.mulf %107, %281 : vector<1x256xf32>
    %283 = arith.addf %279, %282 : vector<1x256xf32>
    %c0_142 = arith.constant 0 : index
    %c7_143 = arith.constant 7 : index
    %c0_144 = arith.constant 0 : index
    %284 = vector.load %arg6[%c0_142, %c7_143, %c0_144] : memref<1x8x256xf32, #tpu.memory_space<vmem>>, vector<1x1x256xf32>
    %285 = vector.shape_cast %284 : vector<1x1x256xf32> to vector<1x256xf32>
    %286 = vector.shape_cast %283 : vector<1x256xf32> to vector<1x1x256xf32>
    tpu.vector_store %arg6[%c0_142, %c7_143, %c0_144], %286 {strides = array<i32>} : memref<1x8x256xf32, #tpu.memory_space<vmem>>, vector<1x1x256xf32>,
    %cst_145 = arith.constant dense<0.000000e+00> : vector<1xf32>
    %287 = vector.multi_reduction <add>, %283, %cst_145 [1] : vector<1x256xf32> to vector<1xf32>
    %288 = vector.shape_cast %287 : vector<1xf32> to vector<1x1xf32>
    %289 = arith.mulf %283, %283 : vector<1x256xf32>
    %cst_146 = arith.constant dense<0.000000e+00> : vector<1xf32>
    %290 = vector.multi_reduction <add>, %289, %cst_146 [1] : vector<1x256xf32> to vector<1xf32>
    %291 = vector.shape_cast %290 : vector<1xf32> to vector<1x1xf32>
    %292 = tpu.concatenate %127, %150, %173, %196, %219, %242, %265, %288 in 1 : vector<1x1xf32>, vector<1x1xf32>, vector<1x1xf32>, vector<1x1xf32>, vector<1x1xf32>, vector<1x1xf32>, vector<1x1xf32>, vector<1x1xf32> -> vector<1x8xf32>
    %293 = tpu.concatenate %130, %153, %176, %199, %222, %245, %268, %291 in 1 : vector<1x1xf32>, vector<1x1xf32>, vector<1x1xf32>, vector<1x1xf32>, vector<1x1xf32>, vector<1x1xf32>, vector<1x1xf32>, vector<1x1xf32> -> vector<1x8xf32>
    %cst_147 = arith.constant dense<0.000000e+00> : vector<8xf32>
    %294 = vector.multi_reduction <add>, %292, %cst_147 [0] : vector<1x8xf32> to vector<8xf32>
    %295 = vector.shape_cast %294 : vector<8xf32> to vector<1x8xf32>
    %c0_148 = arith.constant 0 : index
    %c0_149 = arith.constant 0 : index
    %c0_150 = arith.constant 0 : index
    %296 = vector.load %arg7[%c0_148, %c0_149, %c0_150] : memref<1x1x8xf32, #tpu.memory_space<vmem>>, vector<1x1x8xf32>
    %297 = vector.shape_cast %296 : vector<1x1x8xf32> to vector<1x8xf32>
    %298 = vector.shape_cast %295 : vector<1x8xf32> to vector<1x1x8xf32>
    tpu.vector_store %arg7[%c0_148, %c0_149, %c0_150], %298 {strides = array<i32>} : memref<1x1x8xf32, #tpu.memory_space<vmem>>, vector<1x1x8xf32>,
    %cst_151 = arith.constant dense<0.000000e+00> : vector<8xf32>
    %299 = vector.multi_reduction <add>, %293, %cst_151 [0] : vector<1x8xf32> to vector<8xf32>
    %300 = vector.shape_cast %299 : vector<8xf32> to vector<1x8xf32>
    %c0_152 = arith.constant 0 : index
    %c0_153 = arith.constant 0 : index
    %c0_154 = arith.constant 0 : index
    %301 = vector.load %arg8[%c0_152, %c0_153, %c0_154] : memref<1x1x8xf32, #tpu.memory_space<vmem>>, vector<1x1x8xf32>
    %302 = vector.shape_cast %301 : vector<1x1x8xf32> to vector<1x8xf32>
    %303 = vector.shape_cast %300 : vector<1x8xf32> to vector<1x1x8xf32>
    tpu.vector_store %arg8[%c0_152, %c0_153, %c0_154], %303 {strides = array<i32>} : memref<1x1x8xf32, #tpu.memory_space<vmem>>, vector<1x1x8xf32>,
    return
  }
  func.func @transform_0(%arg0: i32) -> (i32, i32, i32) {
    %c0_i32 = arith.constant 0 : i32
    %c0_i32_0 = arith.constant 0 : i32
    %c0_i32_1 = arith.constant 0 : i32
    %c0_i32_2 = arith.constant 0 : i32
    return %c0_i32, %c0_i32_0, %c0_i32_1 : i32, i32, i32
  }
  func.func @transform_1(%arg0: i32) -> (i32, i32, i32) {
    %c0_i32 = arith.constant 0 : i32
    %c0_i32_0 = arith.constant 0 : i32
    %c0_i32_1 = arith.constant 0 : i32
    %c0_i32_2 = arith.constant 0 : i32
    return %c0_i32, %c0_i32_0, %c0_i32_1 : i32, i32, i32
  }
  func.func @transform_2(%arg0: i32) -> (i32, i32, i32) {
    %c0_i32 = arith.constant 0 : i32
    %c0_i32_0 = arith.constant 0 : i32
    %c0_i32_1 = arith.constant 0 : i32
    %c0_i32_2 = arith.constant 0 : i32
    return %c0_i32, %c0_i32_0, %c0_i32_1 : i32, i32, i32
  }
  func.func @transform_3(%arg0: i32) -> (i32, i32) {
    %c0_i32 = arith.constant 0 : i32
    %c0_i32_0 = arith.constant 0 : i32
    %c0_i32_1 = arith.constant 0 : i32
    return %c0_i32, %c0_i32_0 : i32, i32
  }
  func.func @transform_4(%arg0: i32) -> (i32, i32, i32) {
    %c0_i32 = arith.constant 0 : i32
    %c0_i32_0 = arith.constant 0 : i32
    %c0_i32_1 = arith.constant 0 : i32
    return %arg0, %c0_i32, %c0_i32_0 : i32, i32, i32
  }
  func.func @transform_5(%arg0: i32) -> (i32, i32, i32) {
    %c0_i32 = arith.constant 0 : i32
    %c0_i32_0 = arith.constant 0 : i32
    %c0_i32_1 = arith.constant 0 : i32
    return %arg0, %c0_i32, %c0_i32_0 : i32, i32, i32
  }
  func.func @transform_6(%arg0: i32) -> (i32, i32, i32) {
    %c0_i32 = arith.constant 0 : i32
    %c0_i32_0 = arith.constant 0 : i32
    %c0_i32_1 = arith.constant 0 : i32
    return %arg0, %c0_i32, %c0_i32_0 : i32, i32, i32
  }
  func.func @transform_7(%arg0: i32) -> (i32, i32, i32) {
    %c0_i32 = arith.constant 0 : i32
    %c0_i32_0 = arith.constant 0 : i32
    %c0_i32_1 = arith.constant 0 : i32
    return %arg0, %c0_i32, %c0_i32_0 : i32, i32, i32
  }
}

</mosaic_0001>

<bundles_post_ra>
// kernel: dwconv_forward.3
= control target key start
LH: loop header
LB: loop body
LE: loop exit
PB: predicated region body
PF: predicated region fallthrough
CT: control target
= control target key end

     0   :  { %s298_s12 = smov 0   ;;  %s321_s0 = inlined_call_operand.vmem [shape: f32[1,8,1], index: 0, kind: input, shape index: {}]   ;;  %s322_s1 = inlined_call_operand.vmem [shape: f32[1,8,1], index: 1, kind: input, shape index: {}]   ;;  %s323_s2 = inlined_call_operand.vmem [shape: f32[2,8,256], index: 2, kind: input, shape index: {}, may-alias: {2,3}]   ;;  %s324_s3 = inlined_call_operand.vmem [shape: f32[2,8,256], index: 3, kind: output, shape index: {}, may-alias: {2,3}]  }
   0x1 LB: > { %s246_s13 = sadd.s32 4294967295, %s275_s12   ;;  %p250_p0 = scmp.ge.s32.totalorder %s275_s12, 1  ;;  %s275_s12 = sphi %s298_s12, %s13_s12  }
   0x2   : > { %p137_p1 = scmp.lt.s32.totalorder %s275_s12, 3 }
   0x4   : > { %p138_p2 = pnand %p250_p0, %p137_p1 }
   0x5   : > { %p161_p3 = scmp.lt.s32.totalorder (!%p138_p2), %s246_s13, 1 }
   0x6   : > { %141 = sbr.rel (%p138_p2) target bundleno = 140 (0x8c), region = 32 }
   0xb   : > { %v173_v0 = vld [vmem:[%s321_s0] sm:$0xff]  ;;  %v277_v1 = vmov 0   ;;  %s326_s13 = smov (!%p161_p3, %s246_s13), 1 }
   0xc   : > { %268 = vset.pattern.permute.xlu0 %v277_v1  ;;  %v181_v2 = vld [vmem:[%s322_s1] sm:$0xff]  ;;  %s257_s18 = sshll.u32 %s326_s13, 4 }
   0xd   : > { %176 = vperm.xlu0 %268, %v173_v0   ;;  %s165_s21 = scalar_lea.vmem %s323_s2, %s257_s18  ;;  %s170_s24 = scalar_lea.vmem %s324_s3, %s257_s18 }
   0xe   : > { %v171_v4 = vld [vmem:[%s165_s21] sm:$0xff]  ;;  %v172_v5 = vld [vmem:[%s165_s21 + $0x8] sm:$0xff] }
  0x15   : > { %184 = vperm.xlu0 %268, %v181_v2  }
  0x7f   : > { %v177_v3 = vpop.permute.xlu0 %176 }
  0x80   : > { %v179_v6 = vmul.f32 %v177_v3, %v171_v4  ;;  %v180_v7 = vmul.f32 %v177_v3, %v172_v5 }
  0x87   : > { %v185_v8 = vpop.permute.xlu0 %184 }
  0x88   : > { %v187_v9 = vadd.f32 %v185_v8, %v179_v6  ;;  %v188_v10 = vadd.f32 %v185_v8, %v180_v7 }
  0x8a   : > { %189 = vst [vmem:[%s170_s24] sm:$0xff] %v187_v9 }
  0x8b   : > { %190 = vst [vmem:[%s170_s24 + $0x8] sm:$0xff] %v188_v10 }
  0x8c PF: > { %s13_s12 = sadd.s32 1, %s275_s12  }
  0x8d   : > { %p10_p4 = scmp.ge.s32.totalorder %s13_s12, 4  }
  0x8f   :  { %12 = sbr.rel (!%p10_p4) target bundleno = 1 (0x1), region = 62 }

// kernel: dwconv_forward.2
= control target key start
LH: loop header
LB: loop body
LE: loop exit
PB: predicated region body
PF: predicated region fallthrough
CT: control target
= control target key end

     0   :  { %s1945_s0 = inlined_call_operand.vmem [shape: f32[1,4,1], index: 0, kind: input, shape index: {}]   ;;  %s1946_s1 = inlined_call_operand.vmem [shape: f32[9,4,1], index: 1, kind: input, shape index: {}]   ;;  %s1947_s2 = inlined_call_operand.vmem [shape: f32[3,1,256], index: 2, kind: input, shape index: {}]   ;;  %s1948_s3 = inlined_call_operand.vmem [shape: f32[8,4], index: 3, kind: input, shape index: {}]   ;;  %s1949_s4 = inlined_call_operand.vmem [shape: f32[2,4,256], index: 4, kind: input, shape index: {}]   ;;  %s1950_s5 = inlined_call_operand.vmem [shape: f32[2,8,256], index: 5, kind: output, shape index: {0}]   ;;  %s1951_s6 = inlined_call_operand.vmem [shape: f32[2,1,8], index: 6, kind: output, shape index: {1}]   ;;  %s1952_s7 = inlined_call_operand.vmem [shape: f32[2,1,8], index: 7, kind: output, shape index: {2}]  }
   0x1   :  { %1953 = sst [smem:[#allocation5_spill]] %s1945_s0 }
   0x2   :  { %1954 = sst [smem:[#allocation6_spill]] %s1946_s1 }
   0x3   :  { %1955 = sst [smem:[#allocation7_spill]] %s1947_s2 }
   0x4   :  { %13 = vsyncpa [#allocation3], 0  ;;  %s1430_s24 = smov 0  }
   0x5 LB: > { %s1436_s25 = sadd.s32 4294967295, %s1372_s24   ;;  %p1250_p0 = scmp.ge.s32.totalorder %s1372_s24, 1  ;;  %s1372_s24 = sphi %s1430_s24, %s19_s24  }
   0x6   : > { %p212_p1 = scmp.lt.s32.totalorder %s1372_s24, 3  ;;  %s233_s28 = sshll.u32 %s1948_s3, 4  ;;  %s234_s28 = int_to_ptr.vmem [resolvable:$true] %s233_s28 }
   0x7   : > { %p1318_p3 = scmp.eq.s32.totalorder %s1436_s25, 0  ;;  %s1374_s29 = smov [#allocation2]  }
   0x8   : > { %p213_p2 = pnand %p1250_p0, %p212_p1 }
   0xa   : > { %p1314_p4 = pneg %p213_p2  ;;  %254 = sbr.rel (%p213_p2) target bundleno = 625 (0x271), region = 40 }
   0xc   : > { %p1315_p5 = pnand %p1318_p3, %p1314_p4 }
   0xe   : > { %1317 = dma.vmem_to_smem (!%p1315_p5), %s234_s28, 128, %s1374_s29, [#allocation3]  }
   0xf   : > { %1367 = dma.done.wait (%p1318_p3), [#allocation3], 128  }
  0x10   : > { %1369 = vsyncadd (%p1318_p3), [#allocation3], 4294967168 }
  0x11   : > { %261 = sfence }
  0x12   : > { %s1956_s0 = sld [smem:[#allocation5_spill]]  ;;  %v1375_v1 = vmov 0   ;;  %s1376_s13 = smov 2   ;;  %v1381_v16 = vmov 839922192   ;;  %vm332_vm1 = vcmask 138240  }
  0x13   : > { %1344 = vset.pattern.permute.xlu0 %v1375_v1  ;;  %1345 = vset.pattern.permute.xlu1 %v1375_v1  ;;  %s1957_s1 = sld [smem:[#allocation6_spill]]  ;;  %s1377_s18 = smov 16   ;;  %v318_v17 = vunpack.c.l.s4 %v1381_v16  ;;  %vm390_vm2 = vcmask 15360   ;;  %vm428_vm3 = vcmask 130048   ;;  %vm486_vm4 = vcmask 146432  }
  0x14   : > { %1346 = vset.pattern.permute.xlu2 %v1375_v1  ;;  %s1958_s2 = sld [smem:[#allocation7_spill]]  ;;  %s1378_s23 = smov 18   ;;  %vm524_vm5 = vcmask 261120   ;;  %vm588_vm6 = vcmask 277504   ;;  %vm374_vm7 = vcmask 1039360   ;;  %vm417_vm8 = vcmask 1031168  }
  0x15   : > { %s1379_s26 = smov 32   ;;  %s1380_s10 = smov 34   ;;  %v319_v18 = vunpack.c.0.s8 %v318_v17  ;;  %vm455_vm9 = vcmask 916480   ;;  %vm513_vm10 = vcmask 900096   ;;  %vm551_vm11 = vcmask 785408  }
  0x16   : > { %p294_p6 = scmp.lt.s32.totalorder %s1436_s25, 1  ;;  %s1382_s19 = smov 17   ;;  %vm577_vm12 = vcmask 777216   ;;  %vm615_vm13 = vcmask 769024   ;;  %vm665_vm14 = vcmask 1040384  }
  0x17   : > { %s1383_s20 = smov 127   ;;  %s1384_s21 = smov 95  }
  0x18   : > { %v312_v0 = vld [vmem:[%s1956_s0] sm:$0xf]  ;;  %s1962_s25 = smov (!%p294_p6, %s1436_s25), 1  ;;  %s1385_s22 = smov 126  }
  0x19   : > { %315 = vperm.xlu0 %1344, %v312_v0   ;;  %v347_v2 = vld [vmem:[%s1957_s1] sm:$0xf]  ;;  %v1261_v5 = vld [vmem:[%s1957_s1 + $0x8] sm:$0xf]  ;;  %v1262_v8 = vld [vmem:[%s1957_s1 + $0xc] sm:$0xf] }
  0x1a   : > { %v1260_v3 = vld [vmem:[%s1958_s2 + $0x4] sm:$0x3]  ;;  %350 = vperm.xlu1 %1345, %v347_v2   ;;  %v339_v6 = vld [vmem:[%s1958_s2] sm:$0x3]  ;;  %v1264_v12 = vld [vmem:[%s1957_s1 + $0x14] sm:$0xf] }
  0x1b   : > { %v385_v4 = vperm.slane %v1260_v3, 1  ;;  %v1459_v7 = vperm.slane %v339_v6, 1  ;;  %v1259_v9 = vld [vmem:[%s1957_s1 + $0x4] sm:$0xf]  ;;  %v1468_v10 = vperm.slane %v339_v6, 0  ;;  %v384_v11 = vperm.slane %v1260_v3, 0 }
  0x1c   : > { %359 = vperm.xlu2 %1346, %v1259_v9   ;;  %v1265_v13 = vld [vmem:[%s1957_s1 + $0x18] sm:$0xf]  ;;  %v1266_v14 = vld [vmem:[%s1957_s1 + $0x1c] sm:$0xf]  ;;  %v1263_v15 = vld [vmem:[%s1957_s1 + $0x10] sm:$0xf] }
  0x1d   : > { %v1267_v21 = vld [vmem:[%s1957_s1 + $0x20] sm:$0xf]  ;;  %s1388_s27 = smov 96   ;;  %s1389_s28 = smov 94  }
  0x1e   : > { %s1554_s29 = sld [smem:[#allocation2 + $0x200]] }
  0x1f   : > { %s1556_s30 = sld [smem:[#allocation2 + $0x201]] }
  0x20   : > { %s1558_s8 = sld [smem:[#allocation2 + $0x202]] }
  0x21   : > { %388 = vrot.lane.b32.xlu0 %v385_v4, %s1376_s13  ;;  %s1560_s9 = sld [smem:[#allocation2 + $0x203]] }
  0x22   : > { %402 = vperm.xlu1 %1345, %v1261_v5   ;;  %s1564_s11 = sld [smem:[#allocation2 + $0x81]] }
  0x23   : > { %s1568_s12 = sld [smem:[#allocation2 + $0x82]] }
  0x24   : > { %386 = vrot.lane.b32.xlu2 %v384_v11, %s1376_s13  ;;  %s1308_s13 = sshll.u32 %s1962_s25, 3  ;;  %s1574_s14 = sld [smem:[#allocation2]] }
  0x25   : > { %s298_s16 = scalar_lea.vmem %s1949_s4, %s1308_s13  ;;  %s1572_s13 = sld [smem:[#allocation2 + $0x83]] }
  0x26   : > { %v310_v19 = vld [vmem:[%s298_s16] sm:$0xff]  ;;  %s1576_s15 = sld [smem:[#allocation2 + $0x1]] }
  0x27   : > { %vm311_vm0 = vcmp.gt.f32.partialorder %v310_v19, 0.0  ;;  %s1579_s16 = sld [smem:[#allocation2 + $0x2]] }
  0x28   : > { %s1582_s17 = sld [smem:[#allocation2 + $0x3]] }
  0x29   : > { %426 = vrot.lane.b32.xlu0 %v1459_v7, %s1377_s18  ;;  %s1603_s0 = sld [smem:[#allocation2 + $0x301]] }
  0x2a   : > { %440 = vperm.xlu1 %1345, %v1262_v8   ;;  %s1609_s1 = sld [smem:[#allocation2 + $0x302]] }
  0x2b   : > { %s1614_s2 = sld [smem:[#allocation2 + $0x303]] }
  0x2c   : > { %424 = vrot.lane.b32.xlu2 %v1468_v10, %s1377_s18  ;;  %s1584_s18 = sld [smem:[#allocation2 + $0x180]] }
  0x31   : > { %484 = vrot.lane.b32.xlu0 %v385_v4, %s1378_s23 }
  0x32   : > { %520 = vrot.lane.b32.xlu1 %v1468_v10, %s1379_s26 }
  0x34   : > { %482 = vrot.lane.b32.xlu2 %v384_v11, %s1378_s23  ;;  %s1386_s23 = smov 112  }
  0x39   : > { %498 = vperm.xlu0 %1344, %v1264_v12  }
  0x3a   : > { %536 = vperm.xlu1 %1345, %v1265_v13  }
  0x3c   : > { %522 = vrot.lane.b32.xlu2 %v1459_v7, %s1379_s26  ;;  %s1387_s26 = smov 110  }
  0x41   : > { %586 = vrot.lane.b32.xlu0 %v385_v4, %s1380_s10 }
  0x42   : > { %562 = vperm.xlu1 %1345, %v1266_v14  }
  0x44   : > { %584 = vrot.lane.b32.xlu2 %v384_v11, %s1380_s10  ;;  %s1562_s10 = sld [smem:[#allocation2 + $0x80]] }
  0x49   : > { %466 = vperm.xlu0 %1344, %v1263_v15  }
  0x4c   : > { %600 = vperm.xlu2 %1346, %v1267_v21  }
  0x76   : > { %v360_v40 = vpop.permute.xlu2 %359 }
  0x7e   : > { %v387_v44 = vpop.permute.xlu2 %386 }
  0x86   : > { %v425_v52 = vpop.permute.xlu2 %424 }
  0x8b   : > { %v316_v20 = vpop.permute.xlu0 %315 }
  0x8c   : > { %v320_v22 = vperm.slane %v316_v20, %v319_v18  ;;  %v1502_v35 = vpop.permute.xlu1 %350 }
  0x8e   : > { %v322_v23 = vmul.f32 %v320_v22, %v310_v19  ;;  %v483_v62 = vpop.permute.xlu2 %482 }
  0x90   : > { %v323_v24 = vsel %vm311_vm0, %v310_v19, %v322_v23  ;;  %vm1106_vm0 = vcmask 7168  }
  0x91   : > { %325 = vst [vmem:[#allocation1] ss:$2 sm:$0xff] %v323_v24 }
  0x93   : > { %v389_v25 = vpop.permute.xlu0 %388 }
  0x94   : > { %v403_v36 = vpop.permute.xlu1 %402  ;;  %v391_v55 = vsel %vm390_vm2, %v387_v44, %v389_v25 }
  0x96   : > { %v523_v9 = vpop.permute.xlu2 %522 }
  0x98   : > { %v327_v26 = vld.sshfl [vmem:[#allocation1 + $0x8] sm:$0xff pattern:$0x75316420]  ;;  %v326_v27 = vld.sshfl [vmem:[#allocation1] sm:$0xff pattern:$0x75316420] }
  0x99   : > { %330 = vrot.lane.b32.xlu1 %v327_v26, %s1382_s19  ;;  %328 = vrot.lane.b32.xlu0 %v326_v27, %s1382_s19  ;;  %s1586_s19 = sld [smem:[#allocation2 + $0x181]] }
  0x9b   : > { %v427_v28 = vpop.permute.xlu0 %426 }
  0x9c   : > { %v441_v37 = vpop.permute.xlu1 %440  ;;  %v429_v63 = vsel %vm428_vm3, %v425_v52, %v427_v28  ;;  %vm1111_vm3 = vcmask 31744  }
  0x9e   : > { %v585_v20 = vpop.permute.xlu2 %584 }
  0xa3   : > { %v1496_v29 = vpop.permute.xlu0 %484 }
  0xa4   : > { %v1504_v38 = vpop.permute.xlu1 %520  ;;  %v487_v6 = vsel %vm486_vm4, %v483_v62, %v1496_v29  ;;  %vm1113_vm4 = vcmask 39936  }
  0xa5   : > { %v525_v16 = vsel %vm524_vm5, %v1504_v38, %v523_v9  ;;  %vm1115_vm5 = vcmask 48128  }
  0xab   : > { %v1498_v30 = vpop.permute.xlu0 %498 }
  0xac   : > { %v1506_v39 = vpop.permute.xlu1 %536 }
  0xb3   : > { %v1500_v31 = vpop.permute.xlu0 %586 }
  0xb4   : > { %v563_v41 = vpop.permute.xlu1 %562 }
  0xbb   : > { %v467_v32 = vpop.permute.xlu0 %466 }
  0xbc   : > { %v471_v33 = vperm.slane %v467_v32, %v319_v18 }
  0xbe   : > { %v473_v34 = vmul.f32 %v471_v33, %v323_v24  ;;  %v589_v24 = vsel %vm588_vm6, %v585_v20, %v1500_v31  ;;  %vm1117_vm6 = vcmask 56320  }
  0xc0   : > { %475 = vst [vmem:[#allocation1] ss:$2 sm:$0xff] %v473_v34 }
 0x10b   : > { %v331_v42 = vpop.permute.xlu1 %330  ;;  %v329_v43 = vpop.permute.xlu0 %328 }
 0x10c   : > { %v1508_v45 = vsel %vm332_vm1, %v331_v42, 0.0  ;;  %v1510_v46 = vsel %vm332_vm1, %v329_v43, %v331_v42  ;;  %v1512_v47 = vsel %vm332_vm1, 0.0, %v329_v43  ;;  %vm1109_vm1 = vcmask 23552  }
 0x10d   : > { %v364_v48 = vmul.f32 %v360_v40, %v1508_v45  ;;  %v362_v49 = vmul.f32 %v360_v40, %v1512_v47  ;;  %v363_v50 = vmul.f32 %v360_v40, %v1510_v46  ;;  %v565_v51 = vmul.f32 %v563_v41, %v1512_v47 }
 0x10e   : > { %v566_v53 = vmul.f32 %v563_v41, %v1510_v46  ;;  %v567_v54 = vmul.f32 %v563_v41, %v1508_v45  ;;  %v397_v56 = vmul.f32 %v389_v25, %v1508_v45  ;;  %v395_v57 = vmul.f32 %v387_v44, %v1512_v47 }
 0x10f   : > { %372 = vrot.lane.b32.xlu1 %v364_v48, %s1383_s20  ;;  %368 = vrot.lane.b32.xlu2 %v362_v49, %s1383_s20  ;;  %v396_v58 = vmul.f32 %v391_v55, %v1510_v46  ;;  %v433_v0 = vmul.f32 %v425_v52, %v1512_v47  ;;  %v434_v1 = vmul.f32 %v429_v63, %v1510_v46 }
 0x110   : > { %370 = vrot.lane.b32.xlu0 %v363_v50, %s1383_s20  ;;  %v407_v59 = vmul.f32 %v403_v36, %v397_v56  ;;  %v405_v60 = vmul.f32 %v403_v36, %v395_v57  ;;  %v435_v2 = vmul.f32 %v427_v28, %v1508_v45  ;;  %v491_v8 = vmul.f32 %v483_v62, %v1512_v47  ;;  %v601_v28 = vpop.permute.xlu2 %600  ;;  %s1588_s20 = sld [smem:[#allocation2 + $0x182]]  ;;  %v476_v62 = vld.sshfl [vmem:[#allocation1] sm:$0xff pattern:$0x75316420] }
 0x111   : > { %v406_v61 = vmul.f32 %v403_v36, %v396_v58  ;;  %v443_v3 = vmul.f32 %v441_v37, %v433_v0  ;;  %v444_v4 = vmul.f32 %v441_v37, %v434_v1  ;;  %v492_v11 = vmul.f32 %v487_v6, %v1510_v46  ;;  %v477_v1 = vld.sshfl [vmem:[#allocation1 + $0x8] sm:$0xff pattern:$0x75316420] }
 0x112   : > { %v445_v5 = vmul.f32 %v441_v37, %v435_v2  ;;  %v493_v12 = vmul.f32 %v1496_v29, %v1508_v45  ;;  %v501_v13 = vmul.f32 %v1498_v30, %v491_v8  ;;  %v529_v17 = vmul.f32 %v1504_v38, %v1512_v47 }
 0x113   : > { %v502_v14 = vmul.f32 %v1498_v30, %v492_v11  ;;  %v530_v18 = vmul.f32 %v525_v16, %v1510_v46  ;;  %v531_v19 = vmul.f32 %v523_v9, %v1508_v45  ;;  %v593_v25 = vmul.f32 %v585_v20, %v1512_v47 }
 0x114   : > { %v503_v15 = vmul.f32 %v1498_v30, %v493_v12  ;;  %v539_v21 = vmul.f32 %v1506_v39, %v529_v17  ;;  %v594_v26 = vmul.f32 %v589_v24, %v1510_v46  ;;  %v595_v27 = vmul.f32 %v1500_v31, %v1508_v45 }
 0x115   : > { %v540_v22 = vmul.f32 %v1506_v39, %v530_v18  ;;  %v541_v23 = vmul.f32 %v1506_v39, %v531_v19  ;;  %v603_v29 = vmul.f32 %v601_v28, %v593_v25  ;;  %v345_v45 = vmul.f32 %v1468_v10, %v1512_v47 }
 0x116   : > { %v604_v30 = vmul.f32 %v601_v28, %v594_v26  ;;  %v605_v32 = vmul.f32 %v601_v28, %v595_v27  ;;  %v346_v48 = vmul.f32 %v1459_v7, %v1510_v46  ;;  %v867_v16 = vstv %s1554_s29  ;;  %s1309_s29 = sshll.u32 %s1962_s25, 4 }
 0x117   : > { %571 = vrot.lane.b32.xlu1 %v565_v51, %s1384_s21  ;;  %573 = vrot.lane.b32.xlu2 %v566_v53, %s1384_s21  ;;  %v353_v51 = vmul.f32 %v1502_v35, %v345_v45  ;;  %v871_v17 = vstv %s1556_s30  ;;  %v883_v18 = vstv %s1558_s8 }
 0x118   : > { %575 = vrot.lane.b32.xlu0 %v567_v54, %s1384_s21  ;;  %v354_v10 = vmul.f32 %v1502_v35, %v346_v48  ;;  %s1590_s21 = sld [smem:[#allocation2 + $0x183]]  ;;  %v895_v20 = vstv %s1560_s9  ;;  %v715_v24 = vstv %s1572_s13  ;;  %v623_v25 = vstv %s1574_s14  ;;  %s1691_s9 = scalar_lea.vmem %s1950_s5, %s1309_s29 }
 0x119   : > { %v627_v26 = vstv %s1576_s15  ;;  %v639_v27 = vstv %s1579_s16  ;;  %v651_v28 = vstv %s1582_s17  ;;  %s1824_s13 = sld [smem:[#allocation2 + $0x283]]  ;;  %s306_s17 = scalar_lea.vmem %s1951_s6, %s1962_s25 }
 0x11a   : > { %s1885_s14 = sld [smem:[#allocation2 + $0x383]] }
 0x11f   : > { %415 = vrot.lane.b32.xlu1 %v407_v59, %s1385_s22  ;;  %411 = vrot.lane.b32.xlu2 %v405_v60, %s1385_s22 }
 0x120   : > { %413 = vrot.lane.b32.xlu0 %v406_v61, %s1385_s22  ;;  %s1592_s22 = sld [smem:[#allocation2 + $0x100]] }
 0x127   : > { %449 = vrot.lane.b32.xlu1 %v443_v3, %s1386_s23  ;;  %451 = vrot.lane.b32.xlu2 %v444_v4, %s1386_s23 }
 0x128   : > { %453 = vrot.lane.b32.xlu0 %v445_v5, %s1386_s23  ;;  %s1594_s23 = sld [smem:[#allocation2 + $0x101]] }
 0x12f   : > { %507 = vrot.lane.b32.xlu1 %v501_v13, %s1387_s26  ;;  %509 = vrot.lane.b32.xlu2 %v502_v14, %s1387_s26  ;;  %v668_v14 = vlaneseq }
 0x130   : > { %511 = vrot.lane.b32.xlu0 %v503_v15, %s1387_s26  ;;  %s1596_s26 = sld [smem:[#allocation2 + $0x102]] }
 0x131   : > { %vm1655_vm15 = vcmp.lt.s32.totalorder %v668_v14, 256 }
 0x137   : > { %545 = vrot.lane.b32.xlu1 %v539_v21, %s1388_s27  ;;  %547 = vrot.lane.b32.xlu2 %v540_v22, %s1388_s27  ;;  %v687_v21 = vstv %s1562_s10  ;;  %v691_v22 = vstv %s1564_s11  ;;  %s1750_s10 = sld [smem:[#allocation2 + $0x280]] }
 0x138   : > { %549 = vrot.lane.b32.xlu0 %v541_v23, %s1388_s27  ;;  %s1598_s27 = sld [smem:[#allocation2 + $0x103]]  ;;  %v703_v23 = vstv %s1568_s12 }
 0x139   : > { %s1803_s11 = sld [smem:[#allocation2 + $0x281]] }
 0x13a   : > { %s1811_s12 = sld [smem:[#allocation2 + $0x282]] }
 0x13e   : > { %v775_v45 = vstv %s1598_s27 }
 0x13f   : > { %609 = vrot.lane.b32.xlu1 %v603_v29, %s1389_s28  ;;  %611 = vrot.lane.b32.xlu2 %v604_v30, %s1389_s28  ;;  %v807_v29 = vstv %s1584_s18  ;;  %v811_v30 = vstv %s1586_s19 }
 0x140   : > { %613 = vrot.lane.b32.xlu0 %v605_v32, %s1389_s28  ;;  %s1600_s28 = sld [smem:[#allocation2 + $0x300]] }
 0x146   : > { %v987_v48 = vstv %s1600_s28 }
 0x169   : > { %v369_v33 = vpop.permute.xlu2 %368 }
 0x171   : > { %v1548_v34 = vpop.permute.xlu2 %573 }
 0x179   : > { %v412_v38 = vpop.permute.xlu2 %411 }
 0x181   : > { %v373_v36 = vpop.permute.xlu1 %372  ;;  %v452_v42 = vpop.permute.xlu2 %451 }
 0x182   : > { %v371_v37 = vpop.permute.xlu0 %370 }
 0x183   : > { %v375_v50 = vsel %vm374_vm7, %v369_v33, %v371_v37  ;;  %v376_v52 = vsel %vm374_vm7, %v371_v37, %v373_v36  ;;  %v823_v36 = vstv %s1588_s20  ;;  %v835_v37 = vstv %s1590_s21  ;;  %s309_s20 = scalar_lea.vmem %s1952_s7, %s1962_s25 }
 0x184   : > { %v379_v7 = vadd.f32 %v375_v50, %v353_v51  ;;  %v380_v54 = vadd.f32 %v376_v52, %v354_v10  ;;  %v991_v50 = vstv %s1603_s0  ;;  %v1003_v51 = vstv %s1609_s1  ;;  %s1860_s0 = sld [smem:[#allocation2 + $0x380]] }
 0x185   : > { %v1015_v52 = vstv %s1614_s2  ;;  %s1869_s1 = sld [smem:[#allocation2 + $0x381]]  ;;  %vm1127_vm7 = vcmask 57344  }
 0x186   : > { %s1875_s2 = sld [smem:[#allocation2 + $0x382]] }
 0x189   : > { %v1550_v39 = vpop.permute.xlu1 %571  ;;  %v510_v49 = vpop.permute.xlu2 %509 }
 0x18a   : > { %v1552_v40 = vpop.permute.xlu0 %575  ;;  %v578_v8 = vsel %vm577_vm12, %v1550_v39, %v1548_v34 }
 0x18b   : > { %v579_v12 = vsel %vm577_vm12, %v1548_v34, %v1552_v40 }
 0x191   : > { %v416_v41 = vpop.permute.xlu1 %415  ;;  %v548_v61 = vpop.permute.xlu2 %547 }
 0x192   : > { %v414_v31 = vpop.permute.xlu0 %413 }
 0x193   : > { %v418_v47 = vsel %vm417_vm8, %v412_v38, %v414_v31  ;;  %v419_v46 = vsel %vm417_vm8, %v414_v31, %v416_v41  ;;  %v747_v38 = vstv %s1592_s22  ;;  %v751_v31 = vstv %s1594_s23 }
 0x194   : > { %v422_v57 = vadd.f32 %v418_v47, %v379_v7  ;;  %v423_v59 = vadd.f32 %v419_v46, %v380_v54 }
 0x199   : > { %v450_v43 = vpop.permute.xlu1 %449  ;;  %v612_v32 = vpop.permute.xlu2 %611 }
 0x19a   : > { %v454_v44 = vpop.permute.xlu0 %453  ;;  %v456_v55 = vsel %vm455_vm9, %v450_v43, %v452_v42 }
 0x19b   : > { %v457_v58 = vsel %vm455_vm9, %v452_v42, %v454_v44  ;;  %v460_v35 = vadd.f32 %v456_v55, %v422_v57  ;;  %v763_v42 = vstv %s1596_s26 }
 0x19c   : > { %v461_v60 = vadd.f32 %v457_v58, %v423_v59 }
 0x19d   : > { %v480_v0 = vadd.f32 %v476_v62, %v460_v35 }
 0x19e   : > { %v481_v4 = vadd.f32 %v477_v1, %v461_v60 }
 0x1a1   : > { %v508_v53 = vpop.permute.xlu1 %507 }
 0x1a2   : > { %v512_v56 = vpop.permute.xlu0 %511  ;;  %v514_v63 = vsel %vm513_vm10, %v508_v53, %v510_v49 }
 0x1a3   : > { %v515_v2 = vsel %vm513_vm10, %v510_v49, %v512_v56  ;;  %v518_v9 = vadd.f32 %v514_v63, %v480_v0 }
 0x1a4   : > { %v519_v13 = vadd.f32 %v515_v2, %v481_v4 }
 0x1a9   : > { %v546_v3 = vpop.permute.xlu1 %545 }
 0x1aa   : > { %v552_v5 = vsel %vm551_vm11, %v546_v3, %v548_v61  ;;  %v550_v6 = vpop.permute.xlu0 %549 }
 0x1ab   : > { %v553_v11 = vsel %vm551_vm11, %v548_v61, %v550_v6  ;;  %v556_v15 = vadd.f32 %v552_v5, %v518_v9 }
 0x1ac   : > { %v557_v19 = vadd.f32 %v553_v11, %v519_v13 }
 0x1ad   : > { %v582_v33 = vadd.f32 %v578_v8, %v556_v15 }
 0x1ae   : > { %v583_v39 = vadd.f32 %v579_v12, %v557_v19 }
 0x1b1   : > { %v610_v34 = vpop.permute.xlu1 %609 }
 0x1b2   : > { %v616_v40 = vsel %vm615_vm13, %v610_v34, %v612_v32  ;;  %v614_v41 = vpop.permute.xlu0 %613 }
 0x1b3   : > { %v1636_v43 = vadd.f32 %v616_v40, %v582_v33  ;;  %v617_v44 = vsel %vm615_vm13, %v612_v32, %v614_v41 }
 0x1b4   : > { %v1641_v49 = vadd.f32 %v617_v44, %v583_v39 }
 0x1b5   : > { %v868_v10 = vmul.f32 %v867_v16, %v1636_v43  ;;  %v872_v47 = vmul.f32 %v871_v17, %v1636_v43  ;;  %v884_v7 = vmul.f32 %v883_v18, %v1636_v43  ;;  %v896_v46 = vmul.f32 %v895_v20, %v1636_v43 }
 0x1b6   : > { %v869_v53 = vmul.f32 %v867_v16, %v1641_v49  ;;  %v873_v54 = vmul.f32 %v871_v17, %v1641_v49  ;;  %v885_v55 = vmul.f32 %v883_v18, %v1641_v49  ;;  %v897_v56 = vmul.f32 %v895_v20, %v1641_v49 }
 0x1b7   : > { %v876_v57 = vrot.slane %v872_v47, 1  ;;  %v888_v58 = vrot.slane %v884_v7, 2  ;;  %v900_v59 = vrot.slane %v896_v46, 3  ;;  %v688_v35 = vmul.f32 %v687_v21, %v1636_v43 }
 0x1b8   : > { %v877_v61 = vrot.slane %v873_v54, 1  ;;  %v889_v62 = vrot.slane %v885_v55, 2  ;;  %v901_v63 = vrot.slane %v897_v56, 3  ;;  %v689_v0 = vmul.f32 %v687_v21, %v1641_v49 }
 0x1b9   : > { %v880_v1 = vadd.f32 %v876_v57, %v868_v10  ;;  %v692_v2 = vmul.f32 %v691_v22, %v1636_v43  ;;  %v693_v3 = vmul.f32 %v691_v22, %v1641_v49  ;;  %v704_v4 = vmul.f32 %v703_v23, %v1636_v43 }
 0x1ba   : > { %v881_v5 = vadd.f32 %v877_v61, %v869_v53  ;;  %v705_v6 = vmul.f32 %v703_v23, %v1641_v49  ;;  %v716_v8 = vmul.f32 %v715_v24, %v1636_v43  ;;  %v717_v9 = vmul.f32 %v715_v24, %v1641_v49 }
 0x1bb   : > { %v892_v11 = vadd.f32 %v888_v58, %v880_v1  ;;  %v696_v12 = vrot.slane %v692_v2, 1  ;;  %v697_v13 = vrot.slane %v693_v3, 1  ;;  %v708_v14 = vrot.slane %v704_v4, 2 }
 0x1bc   : > { %v893_v15 = vadd.f32 %v889_v62, %v881_v5  ;;  %v709_v16 = vrot.slane %v705_v6, 2  ;;  %v720_v17 = vrot.slane %v716_v8, 3  ;;  %v721_v18 = vrot.slane %v717_v9, 3 }
 0x1bd   : > { %v1667_v19 = vadd.f32 %v900_v59, %v892_v11  ;;  %v700_v20 = vadd.f32 %v696_v12, %v688_v35  ;;  %v701_v21 = vadd.f32 %v697_v13, %v689_v0  ;;  %v624_v22 = vmul.f32 %v623_v25, %v1636_v43 }
 0x1be   : > { %v1672_v23 = vadd.f32 %v901_v63, %v893_v15  ;;  %v625_v24 = vmul.f32 %v623_v25, %v1641_v49  ;;  %v628_v32 = vmul.f32 %v627_v26, %v1636_v43  ;;  %v629_v33 = vmul.f32 %v627_v26, %v1641_v49 }
 0x1bf   : > { %v914_v34 = vsel %vm665_vm14, %v1667_v19, 0.0  ;;  %v712_v39 = vadd.f32 %v708_v14, %v700_v20  ;;  %v713_v40 = vadd.f32 %v709_v16, %v701_v21  ;;  %v640_v41 = vmul.f32 %v639_v27, %v1636_v43 }
 0x1c0   : > { %v908_v25 = vrot.slane %v1672_v23, 7  ;;  %v915_v44 = vsel %vm665_vm14, %v1672_v23, 0.0  ;;  %v632_v26 = vrot.slane %v628_v32, 1  ;;  %v633_v10 = vrot.slane %v629_v33, 1 }
 0x1c1   : > { %v916_v47 = vadd.f32 %v915_v44, %v914_v34  ;;  %v1696_v7 = vadd.f32 %v720_v17, %v712_v39  ;;  %v1698_v46 = vadd.f32 %v721_v18, %v713_v40  ;;  %v641_v53 = vmul.f32 %v639_v27, %v1641_v49 }
 0x1c2   : > { %v909_v54 = vsel %vm665_vm14, %v1667_v19, %v908_v25  ;;  %v636_v55 = vadd.f32 %v632_v26, %v624_v22  ;;  %v637_v56 = vadd.f32 %v633_v10, %v625_v24  ;;  %v644_v57 = vrot.slane %v640_v41, 2 }
 0x1c3   : > { %917 = vadd.xlane.f32.xlu2 %v916_v47  ;;  %1290 = vst.msk [vmem:[%s1691_s9 + $0x4] ss:$8 sm:$0x3] %vm1655_vm15, %v909_v54  ;;  %v728_v58 = vrot.slane %v1698_v46, 7  ;;  %v734_v59 = vsel %vm665_vm14, %v1696_v7, 0.0  ;;  %v735_v27 = vsel %vm665_vm14, %v1698_v46, 0.0  ;;  %v652_v35 = vmul.f32 %v651_v28, %v1636_v43 }
 0x1c4   : > { %v736_v61 = vadd.f32 %v735_v27, %v734_v59  ;;  %v645_v62 = vrot.slane %v641_v53, 2  ;;  %v648_v63 = vadd.f32 %v644_v57, %v636_v55  ;;  %v653_v0 = vmul.f32 %v651_v28, %v1641_v49 }
 0x1c5   : > { %v729_v1 = vsel %vm665_vm14, %v1696_v7, %v728_v58  ;;  %v656_v2 = vrot.slane %v652_v35, 3  ;;  %v808_v3 = vmul.f32 %v807_v29, %v1636_v43  ;;  %v809_v4 = vmul.f32 %v807_v29, %v1641_v49 }
 0x1c6   : > { %737 = vadd.xlane.f32.xlu0 %v736_v61  ;;  %1275 = vst.msk [vmem:[%s1691_s9 + $0x1] ss:$8 sm:$0x3] %vm1655_vm15, %v729_v1  ;;  %v649_v5 = vadd.f32 %v645_v62, %v637_v56  ;;  %v657_v6 = vrot.slane %v653_v0, 3  ;;  %v812_v28 = vmul.f32 %v811_v30, %v1636_v43  ;;  %v813_v8 = vmul.f32 %v811_v30, %v1641_v49 }
 0x1c7   : > { %v660_v9 = vadd.f32 %v656_v2, %v648_v63  ;;  %v824_v11 = vmul.f32 %v823_v36, %v1636_v43  ;;  %v825_v12 = vmul.f32 %v823_v36, %v1641_v49  ;;  %v836_v29 = vmul.f32 %v835_v37, %v1636_v43 }
 0x1c8   : > { %v661_v13 = vadd.f32 %v657_v6, %v649_v5  ;;  %v816_v14 = vrot.slane %v812_v28, 1  ;;  %v817_v15 = vrot.slane %v813_v8, 1  ;;  %v837_v16 = vmul.f32 %v835_v37, %v1641_v49 }
 0x1c9   : > { %v674_v17 = vsel %vm665_vm14, %v660_v9, 0.0  ;;  %v828_v30 = vrot.slane %v824_v11, 2  ;;  %v829_v18 = vrot.slane %v825_v12, 2  ;;  %v840_v20 = vrot.slane %v836_v29, 3 }
 0x1ca   : > { %v664_v21 = vrot.slane %v661_v13, 7  ;;  %v675_v22 = vsel %vm665_vm14, %v661_v13, 0.0  ;;  %v820_v36 = vadd.f32 %v816_v14, %v808_v3  ;;  %v821_v24 = vadd.f32 %v817_v15, %v809_v4 }
 0x1cb   : > { %v676_v32 = vadd.f32 %v675_v22, %v674_v17  ;;  %v841_v33 = vrot.slane %v837_v16, 3  ;;  %v679_v34 = vmul.f32 %v660_v9, %v660_v9  ;;  %v680_v39 = vmul.f32 %v661_v13, %v661_v13 }
 0x1cc   : > { %v666_v37 = vsel %vm665_vm14, %v660_v9, %v664_v21  ;;  %v832_v40 = vadd.f32 %v828_v30, %v820_v36  ;;  %v833_v41 = vadd.f32 %v829_v18, %v821_v24  ;;  %v748_v25 = vmul.f32 %v747_v38, %v1636_v43 }
 0x1cd   : > { %677 = vadd.xlane.f32.xlu1 %v676_v32  ;;  %672 = vst.msk [vmem:[%s1691_s9] ss:$8 sm:$0x3] %vm1655_vm15, %v666_v37  ;;  %v681_v44 = vsel %vm665_vm14, %v679_v34, 0.0  ;;  %v682_v26 = vsel %vm665_vm14, %v680_v39, 0.0  ;;  %v749_v10 = vmul.f32 %v747_v38, %v1641_v49  ;;  %v752_v47 = vmul.f32 %v751_v31, %v1636_v43 }
 0x1ce   : > { %v1767_v53 = vadd.f32 %v840_v20, %v832_v40  ;;  %v1769_v54 = vadd.f32 %v841_v33, %v833_v41  ;;  %v683_v55 = vadd.f32 %v682_v26, %v681_v44  ;;  %v753_v56 = vmul.f32 %v751_v31, %v1641_v49 }
 0x1cf   : > { %v756_v57 = vrot.slane %v752_v47, 1  ;;  %v764_v58 = vmul.f32 %v763_v42, %v1636_v43  ;;  %v765_v38 = vmul.f32 %v763_v42, %v1641_v49  ;;  %v776_v59 = vmul.f32 %v775_v45, %v1636_v43 }
 0x1d0   : > { %v848_v27 = vrot.slane %v1769_v54, 7  ;;  %v854_v35 = vsel %vm665_vm14, %v1767_v53, 0.0  ;;  %v855_v31 = vsel %vm665_vm14, %v1769_v54, 0.0  ;;  %684 = vadd.xlane.f32.xlu2 %v683_v55  ;;  %v757_v61 = vrot.slane %v753_v56, 1 }
 0x1d1   : > { %v856_v62 = vadd.f32 %v855_v31, %v854_v35  ;;  %v760_v63 = vadd.f32 %v756_v57, %v748_v25  ;;  %v768_v42 = vrot.slane %v764_v58, 2  ;;  %v769_v0 = vrot.slane %v765_v38, 2 }
 0x1d2   : > { %v849_v1 = vsel %vm665_vm14, %v1767_v53, %v848_v27  ;;  %v761_v2 = vadd.f32 %v757_v61, %v749_v10  ;;  %v777_v3 = vmul.f32 %v775_v45, %v1641_v49  ;;  %v780_v4 = vrot.slane %v776_v59, 3 }
 0x1d3   : > { %1285 = vst.msk [vmem:[%s1691_s9 + $0x3] ss:$8 sm:$0x3] %vm1655_vm15, %v849_v1  ;;  %857 = vadd.xlane.f32.xlu0 %v856_v62  ;;  %v772_v5 = vadd.f32 %v768_v42, %v760_v63  ;;  %v988_v6 = vmul.f32 %v987_v48, %v1636_v43  ;;  %v989_v28 = vmul.f32 %v987_v48, %v1641_v49  ;;  %v927_v8 = vstv %s1750_s10 }
 0x1d4   : > { %v773_v9 = vadd.f32 %v769_v0, %v761_v2  ;;  %v781_v45 = vrot.slane %v777_v3, 3  ;;  %v992_v11 = vmul.f32 %v991_v50, %v1636_v43  ;;  %v993_v12 = vmul.f32 %v991_v50, %v1641_v49 }
 0x1d5   : > { %v1813_v29 = vadd.f32 %v780_v4, %v772_v5  ;;  %v1004_v13 = vmul.f32 %v1003_v51, %v1636_v43  ;;  %v1005_v48 = vmul.f32 %v1003_v51, %v1641_v49  ;;  %v1016_v14 = vmul.f32 %v1015_v52, %v1636_v43 }
 0x1d6   : > { %v1826_v15 = vadd.f32 %v781_v45, %v773_v9  ;;  %v996_v16 = vrot.slane %v992_v11, 1  ;;  %v997_v17 = vrot.slane %v993_v12, 1  ;;  %v1017_v50 = vmul.f32 %v1015_v52, %v1641_v49 }
 0x1d7   : > { %v794_v30 = vsel %vm665_vm14, %v1813_v29, 0.0  ;;  %v1008_v18 = vrot.slane %v1004_v13, 2  ;;  %v1009_v20 = vrot.slane %v1005_v48, 2  ;;  %v1020_v21 = vrot.slane %v1016_v14, 3 }
 0x1d8   : > { %v788_v51 = vrot.slane %v1826_v15, 7  ;;  %v795_v22 = vsel %vm665_vm14, %v1826_v15, 0.0  ;;  %v1000_v36 = vadd.f32 %v996_v16, %v988_v6  ;;  %v1001_v24 = vadd.f32 %v997_v17, %v989_v28 }
 0x1d9   : > { %v796_v32 = vadd.f32 %v795_v22, %v794_v30  ;;  %v1021_v33 = vrot.slane %v1017_v50, 3  ;;  %v739_v52 = vmul.f32 %v1696_v7, %v1696_v7  ;;  %v740_v34 = vmul.f32 %v1698_v46, %v1698_v46 }
 0x1da   : > { %v789_v39 = vsel %vm665_vm14, %v1813_v29, %v788_v51  ;;  %v1012_v37 = vadd.f32 %v1008_v18, %v1000_v36  ;;  %v1013_v40 = vadd.f32 %v1009_v20, %v1001_v24  ;;  %v928_v41 = vmul.f32 %v927_v8, %v1636_v43 }
 0x1db   : > { %1280 = vst.msk [vmem:[%s1691_s9 + $0x2] ss:$8 sm:$0x3] %vm1655_vm15, %v789_v39  ;;  %797 = vadd.xlane.f32.xlu1 %v796_v32  ;;  %v741_v25 = vsel %vm665_vm14, %v739_v52, 0.0  ;;  %v742_v7 = vsel %vm665_vm14, %v740_v34, 0.0  ;;  %v929_v44 = vmul.f32 %v927_v8, %v1641_v49  ;;  %v931_v46 = vstv %s1803_s11 }
 0x1dc   : > { %v1850_v26 = vadd.f32 %v1020_v21, %v1012_v37  ;;  %v1852_v10 = vadd.f32 %v1021_v33, %v1013_v40  ;;  %v743_v47 = vadd.f32 %v742_v7, %v741_v25  ;;  %v932_v55 = vmul.f32 %v931_v46, %v1636_v43 }
 0x1dd   : > { %v933_v56 = vmul.f32 %v931_v46, %v1641_v49  ;;  %v943_v57 = vstv %s1811_s12  ;;  %v955_v58 = vstv %s1824_s13  ;;  %v919_v38 = vmul.f32 %v1667_v19, %v1667_v19 }
 0x1de   : > { %v1028_v59 = vrot.slane %v1852_v10, 7  ;;  %v1034_v27 = vsel %vm665_vm14, %v1850_v26, 0.0  ;;  %v1035_v35 = vsel %vm665_vm14, %v1852_v10, 0.0  ;;  %744 = vadd.xlane.f32.xlu2 %v743_v47  ;;  %v936_v31 = vrot.slane %v932_v55, 1 }
 0x1df   : > { %v1036_v61 = vadd.f32 %v1035_v35, %v1034_v27  ;;  %v937_v62 = vrot.slane %v933_v56, 1  ;;  %v944_v63 = vmul.f32 %v943_v57, %v1636_v43  ;;  %v945_v42 = vmul.f32 %v943_v57, %v1641_v49 }
 0x1e0   : > { %v1029_v19 = vsel %vm665_vm14, %v1850_v26, %v1028_v59  ;;  %v940_v0 = vadd.f32 %v936_v31, %v928_v41  ;;  %v956_v1 = vmul.f32 %v955_v58, %v1636_v43  ;;  %v957_v2 = vmul.f32 %v955_v58, %v1641_v49 }
 0x1e1   : > { %1300 = vst.msk [vmem:[%s1691_s9 + $0x6] ss:$8 sm:$0x3] %vm1655_vm15, %v1029_v19  ;;  %1037 = vadd.xlane.f32.xlu0 %v1036_v61  ;;  %v941_v3 = vadd.f32 %v937_v62, %v929_v44  ;;  %v948_v4 = vrot.slane %v944_v63, 2  ;;  %v949_v5 = vrot.slane %v945_v42, 2  ;;  %v920_v6 = vmul.f32 %v1672_v23, %v1672_v23 }
 0x1e2   : > { %v960_v28 = vrot.slane %v956_v1, 3  ;;  %v961_v8 = vrot.slane %v957_v2, 3  ;;  %v921_v9 = vsel %vm665_vm14, %v919_v38, 0.0  ;;  %v799_v45 = vmul.f32 %v1813_v29, %v1813_v29 }
 0x1e3   : > { %v952_v11 = vadd.f32 %v948_v4, %v940_v0  ;;  %v953_v12 = vadd.f32 %v949_v5, %v941_v3  ;;  %v922_v13 = vsel %vm665_vm14, %v920_v6, 0.0  ;;  %v800_v48 = vmul.f32 %v1826_v15, %v1826_v15 }
 0x1e4   : > { %v923_v14 = vadd.f32 %v922_v13, %v921_v9  ;;  %v801_v23 = vsel %vm665_vm14, %v799_v45, 0.0  ;;  %v859_v16 = vmul.f32 %v1767_v53, %v1767_v53  ;;  %v860_v17 = vmul.f32 %v1769_v54, %v1769_v54 }
 0x1e5   : > { %v964_v29 = vadd.f32 %v960_v28, %v952_v11  ;;  %v965_v50 = vadd.f32 %v961_v8, %v953_v12  ;;  %v802_v30 = vsel %vm665_vm14, %v800_v48, 0.0  ;;  %v1047_v18 = vstv %s1860_s0 }
 0x1e6   : > { %v803_v20 = vadd.f32 %v802_v30, %v801_v23  ;;  %v861_v21 = vsel %vm665_vm14, %v859_v16, 0.0  ;;  %v862_v15 = vsel %vm665_vm14, %v860_v17, 0.0  ;;  %v1048_v24 = vmul.f32 %v1047_v18, %v1636_v43 }
 0x1e7   : > { %v968_v51 = vrot.slane %v965_v50, 7  ;;  %v974_v22 = vsel %vm665_vm14, %v964_v29, 0.0  ;;  %v975_v53 = vsel %vm665_vm14, %v965_v50, 0.0  ;;  %v863_v36 = vadd.f32 %v862_v15, %v861_v21 }
 0x1e8   : > { %v976_v54 = vadd.f32 %v975_v53, %v974_v22  ;;  %804 = vadd.xlane.f32.xlu2 %v803_v20  ;;  %v1051_v32 = vstv %s1869_s1  ;;  %v1063_v33 = vstv %s1875_s2  ;;  %v1075_v41 = vstv %s1885_s14 }
 0x1e9   : > { %v969_v52 = vsel %vm665_vm14, %v964_v29, %v968_v51  ;;  %924 = vadd.xlane.f32.xlu0 %v923_v14  ;;  %v1052_v34 = vmul.f32 %v1051_v32, %v1636_v43  ;;  %v1053_v39 = vmul.f32 %v1051_v32, %v1641_v49  ;;  %v1064_v37 = vmul.f32 %v1063_v33, %v1636_v43 }
 0x1ea   : > { %1295 = vst.msk [vmem:[%s1691_s9 + $0x5] ss:$8 sm:$0x3] %vm1655_vm15, %v969_v52  ;;  %977 = vadd.xlane.f32.xlu1 %v976_v54  ;;  %v1065_v40 = vmul.f32 %v1063_v33, %v1641_v49  ;;  %v979_v25 = vmul.f32 %v964_v29, %v964_v29  ;;  %v980_v7 = vmul.f32 %v965_v50, %v965_v50 }
 0x1eb   : > { %v1049_v44 = vmul.f32 %v1047_v18, %v1641_v49  ;;  %v1056_v46 = vrot.slane %v1052_v34, 1  ;;  %v1057_v47 = vrot.slane %v1053_v39, 1  ;;  %v1076_v55 = vmul.f32 %v1075_v41, %v1636_v43 }
 0x1ec   : > { %v1068_v56 = vrot.slane %v1064_v37, 2  ;;  %v1077_v57 = vmul.f32 %v1075_v41, %v1641_v49  ;;  %v981_v58 = vsel %vm665_vm14, %v979_v25, 0.0  ;;  %v982_v38 = vsel %vm665_vm14, %v980_v7, 0.0 }
 0x1ed   : > { %v1060_v59 = vadd.f32 %v1056_v46, %v1048_v24  ;;  %v1061_v27 = vadd.f32 %v1057_v47, %v1049_v44  ;;  %v1069_v35 = vrot.slane %v1065_v40, 2  ;;  %v983_v31 = vadd.f32 %v982_v38, %v981_v58 }
 0x1ee   : > { %v1039_v61 = vmul.f32 %v1850_v26, %v1850_v26  ;;  %v1040_v62 = vmul.f32 %v1852_v10, %v1852_v10  ;;  %v1080_v43 = vrot.slane %v1076_v55, 3  ;;  %v1081_v19 = vrot.slane %v1077_v57, 3 }
 0x1ef   : > { %v1072_v63 = vadd.f32 %v1068_v56, %v1060_v59  ;;  %v1073_v42 = vadd.f32 %v1069_v35, %v1061_v27 }
 0x1f0   : > { %984 = vadd.xlane.f32.xlu2 %v983_v31  ;;  %v1041_v49 = vsel %vm665_vm14, %v1039_v61, 0.0  ;;  %v1042_v0 = vsel %vm665_vm14, %v1040_v62, 0.0 }
 0x1f1   : > { %v1084_v1 = vadd.f32 %v1080_v43, %v1072_v63  ;;  %v1085_v2 = vadd.f32 %v1081_v19, %v1073_v42  ;;  %v1043_v3 = vadd.f32 %v1042_v0, %v1041_v49 }
 0x1f2   : > { %864 = vadd.xlane.f32.xlu1 %v863_v36 }
 0x1f3   : > { %v1088_v4 = vrot.slane %v1085_v2, 7  ;;  %v1099_v5 = vmul.f32 %v1084_v1, %v1084_v1  ;;  %v1100_v26 = vmul.f32 %v1085_v2, %v1085_v2  ;;  %v1094_v6 = vsel %vm665_vm14, %v1084_v1, 0.0 }
 0x1f4   : > { %v1095_v10 = vsel %vm665_vm14, %v1085_v2, 0.0 }
 0x1f5   : > { %v1089_v28 = vsel %vm665_vm14, %v1084_v1, %v1088_v4  ;;  %v1101_v8 = vsel %vm665_vm14, %v1099_v5, 0.0  ;;  %v1102_v9 = vsel %vm665_vm14, %v1100_v26, 0.0  ;;  %v1096_v45 = vadd.f32 %v1095_v10, %v1094_v6 }
 0x1f6   : > { %1305 = vst.msk [vmem:[%s1691_s9 + $0x7] ss:$8 sm:$0x3] %vm1655_vm15, %v1089_v28  ;;  %v1103_v11 = vadd.f32 %v1102_v9, %v1101_v8 }
 0x1f8   : > { %1104 = vadd.xlane.f32.xlu0 %v1103_v11  ;;  %1097 = vadd.xlane.f32.xlu2 %v1096_v45 }
 0x1fa   : > { %1044 = vadd.xlane.f32.xlu1 %v1043_v3 }
 0x236   : > { %v918_v12 = vpop.xlane.xlu2 %917 }
 0x239   : > { %v738_v13 = vpop.xlane.xlu0 %737 }
 0x240   : > { %v678_v14 = vpop.xlane.xlu1 %677 }
 0x241   : > { %v1107_v18 = vsel %vm1106_vm0, %v678_v14, %v738_v13 }
 0x243   : > { %v685_v48 = vpop.xlane.xlu2 %684 }
 0x246   : > { %v858_v23 = vpop.xlane.xlu0 %857 }
 0x24e   : > { %v798_v17 = vpop.xlane.xlu1 %797 }
 0x24f   : > { %v1108_v60 = vsel %vm390_vm2, %v1107_v18, %v798_v17 }
 0x250   : > { %v1110_v15 = vsel %vm1109_vm1, %v1108_v60, %v858_v23 }
 0x251   : > { %v745_v16 = vpop.xlane.xlu2 %744  ;;  %v1112_v36 = vsel %vm1111_vm3, %v1110_v15, %v918_v12 }
 0x252   : > { %v1119_v20 = vsel %vm1106_vm0, %v685_v48, %v745_v16 }
 0x254   : > { %v1038_v29 = vpop.xlane.xlu0 %1037 }
 0x25b   : > { %v805_v50 = vpop.xlane.xlu2 %804 }
 0x25c   : > { %v925_v51 = vpop.xlane.xlu0 %924  ;;  %v1120_v22 = vsel %vm390_vm2, %v1119_v20, %v805_v50 }
 0x25d   : > { %v978_v30 = vpop.xlane.xlu1 %977 }
 0x25e   : > { %v1114_v24 = vsel %vm1113_vm4, %v1112_v36, %v978_v30 }
 0x25f   : > { %v1116_v34 = vsel %vm1115_vm5, %v1114_v24, %v1038_v29 }
 0x263   : > { %v985_v21 = vpop.xlane.xlu2 %984 }
 0x265   : > { %v865_v53 = vpop.xlane.xlu1 %864 }
 0x266   : > { %v1121_v54 = vsel %vm1109_vm1, %v1120_v22, %v865_v53 }
 0x267   : > { %v1122_v32 = vsel %vm1111_vm3, %v1121_v54, %v925_v51 }
 0x268   : > { %v1123_v33 = vsel %vm1113_vm4, %v1122_v32, %v985_v21 }
 0x26b   : > { %v1098_v52 = vpop.xlane.xlu2 %1097  ;;  %v1105_v40 = vpop.xlane.xlu0 %1104 }
 0x26c   : > { %v1118_v39 = vsel %vm1117_vm6, %v1116_v34, %v1098_v52 }
 0x26d   : > { %v1045_v37 = vpop.xlane.xlu1 %1044  ;;  %1128 = vst.msk [vmem:[%s306_s17] sm:$0x1] %vm1127_vm7, %v1118_v39 }
 0x26e   : > { %v1124_v41 = vsel %vm1115_vm5, %v1123_v33, %v1045_v37 }
 0x26f   : > { %v1125_v25 = vsel %vm1117_vm6, %v1124_v41, %v1105_v40 }
 0x270   : > { %1130 = vst.msk [vmem:[%s309_s20] sm:$0x1] %vm1127_vm7, %v1125_v25 }
 0x271 PF: > { %s19_s24 = sadd.s32 1, %s1372_s24  }
 0x272   : > { %p16_p7 = scmp.ge.s32.totalorder %s19_s24, 4  }
 0x274   :  { %18 = sbr.rel (!%p16_p7) target bundleno = 5 (0x5), region = 115 }
 0x279   :  { %1176 = vsyncpa [#allocation3], 1 }
 0x27a   :  { %1178 = vsyncpa [#allocation3 + $0x1], 1 }

</bundles_post_ra>
